<compile_context>
chip_gen: v5e
topology: v5e:2x2
jax: 0.10.0
libtpu: 0.0.40
codegen_flags: <defaults>
</compile_context>

<pallas_src>
import math

import jax
import jax.numpy as jnp
from jax.experimental import pallas as pl
from jax.experimental.pallas import tpu as pltpu

# ---------------- config (small synthetic shapes) ----------------
B = 2            # batch
S = 8            # max_seq_len
H = 32           # bert.config.hidden_size
NUM_HEADS = 4
D_HEAD = H // NUM_HEADS
FF = 64          # intermediate size
NUM_LAYERS = 2
VOCAB = 50
TYPE_VOCAB = 2
TOP_SIZES = (16, 16)   # top_layer_sizes -> Linear(32,16)+ReLU+Dropout+Linear(16,16)+ReLU
POOLING = "avg"        # pooling_type ('cls' also supported, selected statically)
LN_EPS = 1e-12


def _vmem_spec():
    return pl.BlockSpec(memory_space=pltpu.MemorySpace.VMEM)


# ---------------- in-kernel helpers (traced inside the kernel) ----------------
def _layer_norm(x, g, b):
    mu = jnp.mean(x, axis=-1, keepdims=True)
    var = jnp.mean((x - mu) ** 2, axis=-1, keepdims=True)
    return (x - mu) * jax.lax.rsqrt(var + LN_EPS) * g + b


def _gelu(x):
    # TODO(synk): tanh-approx GELU; HF BERT's default 'gelu' is the exact erf form
    # (difference is ~1e-3 relative and erf lowering is not guaranteed in Mosaic).
    c = math.sqrt(2.0 / math.pi)
    return 0.5 * x * (1.0 + jnp.tanh(c * (x + 0.044715 * x * x * x)))


# ---------------- single fused Pallas kernel ----------------
def bert_encoder_kernel(ids_ref, tids_ref, mask_ref,
                        emb_tbl_ref, pos_ref,
                        emb_ln_g_ref, emb_ln_b_ref,
                        wqkv_ref, bqkv_ref, wo_ref, bo_ref,
                        ln1_g_ref, ln1_b_ref,
                        w1_ref, b1_ref, w2_ref, b2_ref,
                        ln2_g_ref, ln2_b_ref,
                        top_w1_ref, top_b1_ref, top_w2_ref, top_b2_ref,
                        o_ref):
    mask = mask_ref[...]                                        # (B, S) float, 1 = keep

    # ---- additive attention-mask bias: materialized ONCE at full (NH*B, S, S) ----
    neg = (1.0 - mask) * -10000.0                               # (B, S)
    neg_all = jnp.concatenate([neg] * NUM_HEADS, axis=0)        # (NH*B, S)
    attn_bias = jnp.broadcast_to(neg_all[:, None, :],
                                 (NUM_HEADS * B, S, S))         # (NH*B, S, S)

    # ---- in-kernel embedding gather: one-hot (word | shifted-type) @ fused table ----
    ids = ids_ref[...]                                          # (B*S, 1) int32
    tids = tids_ref[...] + VOCAB                                # shifted into fused table
    iota = jax.lax.broadcasted_iota(jnp.int32, (B * S, VOCAB + TYPE_VOCAB), 1)
    onehot = jnp.logical_or(iota == ids, iota == tids).astype(jnp.bfloat16)
    emb = jnp.dot(onehot, emb_tbl_ref[...],
                  preferred_element_type=jnp.float32)           # word_emb + type_emb, (B*S, H)
    emb = emb + jnp.concatenate([pos_ref[...]] * B, axis=0)     # + position embeddings
    h = _layer_norm(emb, emb_ln_g_ref[...], emb_ln_b_ref[...])  # (B*S, H) f32 residual stream

    scale = 1.0 / math.sqrt(D_HEAD)

    for l in range(NUM_LAYERS):            # static Python loop, NUM_LAYERS = 2
        # ---- self-attention: fused QKV projection (one bf16 MXU matmul) ----
        qkv = jnp.dot(h.astype(jnp.bfloat16), wqkv_ref[l],
                      preferred_element_type=jnp.float32) + bqkv_ref[l]    # (B*S, 3H)
        qkv = qkv.reshape(B, S, 3 * H).astype(jnp.bfloat16)

        # fold heads into the leading (outer) dim -> single-batch-dim einsums
        q_all = jnp.concatenate(
            [qkv[:, :, 0 * H + hd * D_HEAD:0 * H + (hd + 1) * D_HEAD]
             for hd in range(NUM_HEADS)], axis=0)               # (NH*B, S, Dh)
        k_all = jnp.concatenate(
            [qkv[:, :, 1 * H + hd * D_HEAD:1 * H + (hd + 1) * D_HEAD]
             for hd in range(NUM_HEADS)], axis=0)
        v_all = jnp.concatenate(
            [qkv[:, :, 2 * H + hd * D_HEAD:2 * H + (hd + 1) * D_HEAD]
             for hd in range(NUM_HEADS)], axis=0)

        s = jnp.einsum('bqd,bkd->bqk', q_all, k_all,
                       preferred_element_type=jnp.float32) * scale + attn_bias
        s = s - jnp.max(s, axis=-1, keepdims=True)
        p = jnp.exp(s)
        p = p * pl.reciprocal(jnp.sum(p, axis=-1, keepdims=True), approx=True)
        ctx_all = jnp.einsum('bqk,bkd->bqd', p.astype(jnp.bfloat16), v_all,
                             preferred_element_type=jnp.float32)           # (NH*B, S, Dh)

        # un-fold heads back into their lane slots, then ONE full-width Wo matmul
        ctx = jnp.concatenate([ctx_all[hd * B:(hd + 1) * B]
                               for hd in range(NUM_HEADS)], axis=-1)       # (B, S, H)
        attn_out = jnp.dot(ctx.reshape(B * S, H).astype(jnp.bfloat16), wo_ref[l],
                           preferred_element_type=jnp.float32) + bo_ref[l]

        h1 = _layer_norm(h + attn_out, ln1_g_ref[l], ln1_b_ref[l])

        # ---- feed-forward ----
        ff = jnp.dot(h1.astype(jnp.bfloat16), w1_ref[l],
                     preferred_element_type=jnp.float32) + b1_ref[l]       # (B*S, FF)
        ff = _gelu(ff)
        ff_out = jnp.dot(ff.astype(jnp.bfloat16), w2_ref[l],
                         preferred_element_type=jnp.float32) + b2_ref[l]   # (B*S, H)
        h = _layer_norm(h1 + ff_out, ln2_g_ref[l], ln2_b_ref[l])

    # ---- pooling (matches torch: divide by the SCALAR sum of attention_mask) ----
    h3 = h.reshape(B, S, H)
    if POOLING == "cls":
        pooled = h3[:, 0, :]
    else:
        pooled = jnp.sum(h3 * mask[:, :, None], axis=1) / jnp.sum(mask)    # (B, H)

    # ---- top MLP head ----
    x = jnp.dot(pooled.astype(jnp.bfloat16), top_w1_ref[...],
                preferred_element_type=jnp.float32) + top_b1_ref[...]
    x = jnp.maximum(x, 0.0)
    # TODO(synk): nn.Dropout between top layers is treated as identity (eval-mode forward).
    x = jnp.dot(x.astype(jnp.bfloat16), top_w2_ref[...],
                preferred_element_type=jnp.float32) + top_b2_ref[...]
    x = jnp.maximum(x, 0.0)

    # F.normalize(p=2, dim=1, eps=1e-12): exact divide (no approx reciprocal here)
    nrm = jnp.sqrt(jnp.sum(x * x, axis=1, keepdims=True))
    o_ref[...] = x / jnp.maximum(nrm, 1e-12)


# ---------------- deterministic parameter init (fused/stacked, bf16 matmul weights) ----------------
def init_params(key):
    def nrm(k, shape, scale=0.02, dtype=jnp.bfloat16):
        return (scale * jax.random.normal(k, shape)).astype(dtype)

    keys = iter(jax.random.split(key, 256))

    word_emb = nrm(next(keys), (VOCAB, H))
    type_emb = nrm(next(keys), (TYPE_VOCAB, H))
    p = {
        # fused word||type embedding table -> single one-hot gather matmul in-kernel
        "emb_tbl": jnp.concatenate([word_emb, type_emb], axis=0),      # (VOCAB+TYPE_VOCAB, H) bf16
        "pos_emb": nrm(next(keys), (S, H), dtype=jnp.float32),
        "emb_ln_g": jnp.ones((1, H), jnp.float32),
        "emb_ln_b": jnp.zeros((1, H), jnp.float32),
    }

    wqkv, bqkv, wo, bo = [], [], [], []
    ln1g, ln1b, w1, b1, w2, b2, ln2g, ln2b = [], [], [], [], [], [], [], []
    for _ in range(NUM_LAYERS):
        wq = nrm(next(keys), (H, H))
        wk = nrm(next(keys), (H, H))
        wv = nrm(next(keys), (H, H))
        wqkv.append(jnp.concatenate([wq, wk, wv], axis=1))       # (H, 3H) fused QKV, bf16
        bqkv.append(jnp.zeros((1, 3 * H), jnp.float32))
        wo.append(nrm(next(keys), (H, H)))
        bo.append(jnp.zeros((1, H), jnp.float32))
        ln1g.append(jnp.ones((1, H), jnp.float32))
        ln1b.append(jnp.zeros((1, H), jnp.float32))
        w1.append(nrm(next(keys), (H, FF)))
        b1.append(jnp.zeros((1, FF), jnp.float32))
        w2.append(nrm(next(keys), (FF, H)))
        b2.append(jnp.zeros((1, H), jnp.float32))
        ln2g.append(jnp.ones((1, H), jnp.float32))
        ln2b.append(jnp.zeros((1, H), jnp.float32))

    p.update(
        wqkv=jnp.stack(wqkv), bqkv=jnp.stack(bqkv),
        wo=jnp.stack(wo), bo=jnp.stack(bo),
        ln1_g=jnp.stack(ln1g), ln1_b=jnp.stack(ln1b),
        w1=jnp.stack(w1), b1=jnp.stack(b1),
        w2=jnp.stack(w2), b2=jnp.stack(b2),
        ln2_g=jnp.stack(ln2g), ln2_b=jnp.stack(ln2b),
    )

    # top MLP head: Linear(H, TOP_SIZES[0]) + ReLU + Dropout + Linear(..., TOP_SIZES[1]) + ReLU
    p["top_w1"] = nrm(next(keys), (H, TOP_SIZES[0]), scale=1.0 / math.sqrt(H))
    p["top_b1"] = jnp.zeros((1, TOP_SIZES[0]), jnp.float32)
    p["top_w2"] = nrm(next(keys), (TOP_SIZES[0], TOP_SIZES[1]),
                      scale=1.0 / math.sqrt(TOP_SIZES[0]))
    p["top_b2"] = jnp.zeros((1, TOP_SIZES[1]), jnp.float32)
    return p


# ---------------- forward: everything (incl. embedding gather) fused in one Pallas call ----------------
def bert_encoder_forward(params, input_ids, attention_mask, token_type_ids):
    ids = input_ids.reshape(B * S, 1).astype(jnp.int32)
    tids = token_type_ids.reshape(B * S, 1).astype(jnp.int32)
    mask_f = attention_mask.astype(jnp.float32)

    args = (ids, tids, mask_f,
            params["emb_tbl"], params["pos_emb"],
            params["emb_ln_g"], params["emb_ln_b"],
            params["wqkv"], params["bqkv"], params["wo"], params["bo"],
            params["ln1_g"], params["ln1_b"],
            params["w1"], params["b1"], params["w2"], params["b2"],
            params["ln2_g"], params["ln2_b"],
            params["top_w1"], params["top_b1"], params["top_w2"], params["top_b2"])

    return pl.pallas_call(
        bert_encoder_kernel,
        out_shape=jax.ShapeDtypeStruct((B, TOP_SIZES[-1]), jnp.float32),
        in_specs=[_vmem_spec() for _ in args],
        out_specs=_vmem_spec(),
    )(*args)


if __name__ == "__main__":
    key = jax.random.PRNGKey(0)
    k_param, k_ids, k_type = jax.random.split(key, 3)

    params = init_params(k_param)

    input_ids = jax.random.randint(k_ids, (B, S), 0, VOCAB, dtype=jnp.int32)
    # padded batch: first row full length, second row only 5 valid tokens
    attention_mask = jnp.array([[1, 1, 1, 1, 1, 1, 1, 1],
                                [1, 1, 1, 1, 1, 0, 0, 0]], dtype=jnp.int32)
    token_type_ids = jax.random.randint(k_type, (B, S), 0, TYPE_VOCAB, dtype=jnp.int32)

    out = jax.jit(bert_encoder_forward)(params, input_ids, attention_mask, token_type_ids)
    out = jax.block_until_ready(out)

    assert out.shape == (B, TOP_SIZES[-1])
    assert bool(jnp.all(jnp.isfinite(out)))
    print("KERNEL_OK")
</pallas_src>

<mosaic_0001>
module attributes {stable_mosaic.version = 11 : i64} {
  func.func @bert_encoder_kernel(%arg0: memref<16x1xi32, #tpu.memory_space<vmem>>, %arg1: memref<16x1xi32, #tpu.memory_space<vmem>>, %arg2: memref<2x8xf32, #tpu.memory_space<vmem>>, %arg3: memref<52x32xbf16, #tpu.memory_space<vmem>>, %arg4: memref<8x32xf32, #tpu.memory_space<vmem>>, %arg5: memref<1x32xf32, #tpu.memory_space<vmem>>, %arg6: memref<1x32xf32, #tpu.memory_space<vmem>>, %arg7: memref<2x32x96xbf16, #tpu.memory_space<vmem>>, %arg8: memref<2x1x96xf32, #tpu.memory_space<vmem>>, %arg9: memref<2x32x32xbf16, #tpu.memory_space<vmem>>, %arg10: memref<2x1x32xf32, #tpu.memory_space<vmem>>, %arg11: memref<2x1x32xf32, #tpu.memory_space<vmem>>, %arg12: memref<2x1x32xf32, #tpu.memory_space<vmem>>, %arg13: memref<2x32x64xbf16, #tpu.memory_space<vmem>>, %arg14: memref<2x1x64xf32, #tpu.memory_space<vmem>>, %arg15: memref<2x64x32xbf16, #tpu.memory_space<vmem>>, %arg16: memref<2x1x32xf32, #tpu.memory_space<vmem>>, %arg17: memref<2x1x32xf32, #tpu.memory_space<vmem>>, %arg18: memref<2x1x32xf32, #tpu.memory_space<vmem>>, %arg19: memref<32x16xbf16, #tpu.memory_space<vmem>>, %arg20: memref<1x16xf32, #tpu.memory_space<vmem>>, %arg21: memref<16x16xbf16, #tpu.memory_space<vmem>>, %arg22: memref<1x16xf32, #tpu.memory_space<vmem>>, %arg23: memref<2x16xf32, #tpu.memory_space<vmem>>) attributes {dimension_semantics = [], scalar_prefetch = 0 : i64, scratch_operands = 0 : i64, tpu.core_type = #tpu.core_type<tc>} {
    %c0 = arith.constant 0 : index
    %c0_0 = arith.constant 0 : index
    %0 = vector.load %arg2[%c0, %c0_0] : memref<2x8xf32, #tpu.memory_space<vmem>>, vector<2x8xf32>
    %cst = arith.constant 1.000000e+00 : f32
    %1 = vector.broadcast %cst : f32 to vector<2x8xf32>
    %2 = arith.subf %1, %0 : vector<2x8xf32>
    %cst_1 = arith.constant -1.000000e+04 : f32
    %3 = vector.broadcast %cst_1 : f32 to vector<2x8xf32>
    %4 = arith.mulf %2, %3 : vector<2x8xf32>
    %5 = tpu.concatenate %4, %4, %4, %4 in 0 : vector<2x8xf32>, vector<2x8xf32>, vector<2x8xf32>, vector<2x8xf32> -> vector<8x8xf32>
    %6 = vector.shape_cast %5 : vector<8x8xf32> to vector<8x1x8xf32>
    %7 = vector.shape_cast %6 : vector<8x1x8xf32> to vector<8x1x8xf32>
    %8 = vector.broadcast %7 : vector<8x1x8xf32> to vector<8x8x8xf32>
    %c0_2 = arith.constant 0 : index
    %c0_3 = arith.constant 0 : index
    %9 = vector.load %arg0[%c0_2, %c0_3] : memref<16x1xi32, #tpu.memory_space<vmem>>, vector<16x1xi32>
    %c0_4 = arith.constant 0 : index
    %c0_5 = arith.constant 0 : index
    %10 = vector.load %arg1[%c0_4, %c0_5] : memref<16x1xi32, #tpu.memory_space<vmem>>, vector<16x1xi32>
    %c50_i32 = arith.constant 50 : i32
    %11 = vector.broadcast %c50_i32 : i32 to vector<16x1xi32>
    %12 = arith.addi %10, %11 : vector<16x1xi32>
    %13 = tpu.iota {dimensions = array<i32: 1>} : vector<16x52xi32>
    %14 = vector.broadcast %9 : vector<16x1xi32> to vector<16x52xi32>
    %15 = arith.cmpi eq, %13, %14 : vector<16x52xi32>
    %16 = vector.broadcast %12 : vector<16x1xi32> to vector<16x52xi32>
    %17 = arith.cmpi eq, %13, %16 : vector<16x52xi32>
    %18 = arith.ori %15, %17 : vector<16x52xi1>
    %19 = arith.extui %18 : vector<16x52xi1> to vector<16x52xi32>
    %20 = arith.sitofp %19 : vector<16x52xi32> to vector<16x52xf32>
    %21 = arith.truncf %20 : vector<16x52xf32> to vector<16x52xbf16>
    %c0_6 = arith.constant 0 : index
    %c0_7 = arith.constant 0 : index
    %22 = vector.load %arg3[%c0_6, %c0_7] : memref<52x32xbf16, #tpu.memory_space<vmem>>, vector<52x32xbf16>
    %cst_8 = arith.constant dense<0.000000e+00> : vector<16x32xf32>
    %23 = tpu.matmul %21, %22, %cst_8 {dimension_numbers = #tpu.dot_dimension_numbers<[1], [0], [0], [1], [0, 0, 1, 1], [], []>} : vector<16x52xbf16>, vector<52x32xbf16>, vector<16x32xf32> -> vector<16x32xf32>
    %c0_9 = arith.constant 0 : index
    %c0_10 = arith.constant 0 : index
    %24 = vector.load %arg4[%c0_9, %c0_10] : memref<8x32xf32, #tpu.memory_space<vmem>>, vector<8x32xf32>
    %25 = tpu.concatenate %24, %24 in 0 : vector<8x32xf32>, vector<8x32xf32> -> vector<16x32xf32>
    %26 = arith.addf %23, %25 : vector<16x32xf32>
    %c0_11 = arith.constant 0 : index
    %c0_12 = arith.constant 0 : index
    %27 = vector.load %arg5[%c0_11, %c0_12] : memref<1x32xf32, #tpu.memory_space<vmem>>, vector<1x32xf32>
    %c0_13 = arith.constant 0 : index
    %c0_14 = arith.constant 0 : index
    %28 = vector.load %arg6[%c0_13, %c0_14] : memref<1x32xf32, #tpu.memory_space<vmem>>, vector<1x32xf32>
    %cst_15 = arith.constant dense<0.000000e+00> : vector<16xf32>
    %29 = vector.multi_reduction <add>, %26, %cst_15 [1] : vector<16x32xf32> to vector<16xf32>
    %30 = vector.shape_cast %29 : vector<16xf32> to vector<16x1xf32>
    %cst_16 = arith.constant 3.200000e+01 : f32
    %31 = vector.broadcast %cst_16 : f32 to vector<16x1xf32>
    %32 = arith.divf %30, %31 : vector<16x1xf32>
    %33 = vector.broadcast %32 : vector<16x1xf32> to vector<16x32xf32>
    %34 = arith.subf %26, %33 : vector<16x32xf32>
    %35 = arith.mulf %34, %34 : vector<16x32xf32>
    %cst_17 = arith.constant dense<0.000000e+00> : vector<16xf32>
    %36 = vector.multi_reduction <add>, %35, %cst_17 [1] : vector<16x32xf32> to vector<16xf32>
    %37 = vector.shape_cast %36 : vector<16xf32> to vector<16x1xf32>
    %cst_18 = arith.constant 3.200000e+01 : f32
    %38 = vector.broadcast %cst_18 : f32 to vector<16x1xf32>
    %39 = arith.divf %37, %38 : vector<16x1xf32>
    %40 = vector.broadcast %32 : vector<16x1xf32> to vector<16x32xf32>
    %41 = arith.subf %26, %40 : vector<16x32xf32>
    %cst_19 = arith.constant 9.99999996E-13 : f32
    %42 = vector.broadcast %cst_19 : f32 to vector<16x1xf32>
    %43 = arith.addf %39, %42 : vector<16x1xf32>
    %44 = math.rsqrt %43 : vector<16x1xf32>
    %45 = vector.broadcast %44 : vector<16x1xf32> to vector<16x32xf32>
    %46 = arith.mulf %41, %45 : vector<16x32xf32>
    %47 = vector.broadcast %27 : vector<1x32xf32> to vector<16x32xf32>
    %48 = arith.mulf %46, %47 : vector<16x32xf32>
    %49 = vector.broadcast %28 : vector<1x32xf32> to vector<16x32xf32>
    %50 = arith.addf %48, %49 : vector<16x32xf32>
    %51 = arith.truncf %50 : vector<16x32xf32> to vector<16x32xbf16>
    %c0_20 = arith.constant 0 : index
    %c0_21 = arith.constant 0 : index
    %c0_22 = arith.constant 0 : index
    %52 = vector.load %arg7[%c0_20, %c0_21, %c0_22] : memref<2x32x96xbf16, #tpu.memory_space<vmem>>, vector<1x32x96xbf16>
    %53 = vector.shape_cast %52 : vector<1x32x96xbf16> to vector<32x96xbf16>
    %cst_23 = arith.constant dense<0.000000e+00> : vector<16x96xf32>
    %54 = tpu.matmul %51, %53, %cst_23 {dimension_numbers = #tpu.dot_dimension_numbers<[1], [0], [0], [1], [0, 0, 1, 1], [], []>} : vector<16x32xbf16>, vector<32x96xbf16>, vector<16x96xf32> -> vector<16x96xf32>
    %c0_24 = arith.constant 0 : index
    %c0_25 = arith.constant 0 : index
    %c0_26 = arith.constant 0 : index
    %55 = vector.load %arg8[%c0_24, %c0_25, %c0_26] : memref<2x1x96xf32, #tpu.memory_space<vmem>>, vector<1x1x96xf32>
    %56 = vector.shape_cast %55 : vector<1x1x96xf32> to vector<1x96xf32>
    %57 = vector.broadcast %56 : vector<1x96xf32> to vector<16x96xf32>
    %58 = arith.addf %54, %57 : vector<16x96xf32>
    %59 = vector.shape_cast %58 : vector<16x96xf32> to vector<2x8x96xf32>
    %60 = arith.truncf %59 : vector<2x8x96xf32> to vector<2x8x96xbf16>
    %61 = vector.extract_strided_slice %60 {offsets = [0, 0, 0], sizes = [2, 8, 8], strides = [1, 1, 1]} : vector<2x8x96xbf16> to vector<2x8x8xbf16>
    %62 = vector.extract_strided_slice %60 {offsets = [0, 0, 8], sizes = [2, 8, 8], strides = [1, 1, 1]} : vector<2x8x96xbf16> to vector<2x8x8xbf16>
    %63 = vector.extract_strided_slice %60 {offsets = [0, 0, 16], sizes = [2, 8, 8], strides = [1, 1, 1]} : vector<2x8x96xbf16> to vector<2x8x8xbf16>
    %64 = vector.extract_strided_slice %60 {offsets = [0, 0, 24], sizes = [2, 8, 8], strides = [1, 1, 1]} : vector<2x8x96xbf16> to vector<2x8x8xbf16>
    %65 = tpu.concatenate %61, %62, %63, %64 in 0 : vector<2x8x8xbf16>, vector<2x8x8xbf16>, vector<2x8x8xbf16>, vector<2x8x8xbf16> -> vector<8x8x8xbf16>
    %66 = vector.extract_strided_slice %60 {offsets = [0, 0, 32], sizes = [2, 8, 8], strides = [1, 1, 1]} : vector<2x8x96xbf16> to vector<2x8x8xbf16>
    %67 = vector.extract_strided_slice %60 {offsets = [0, 0, 40], sizes = [2, 8, 8], strides = [1, 1, 1]} : vector<2x8x96xbf16> to vector<2x8x8xbf16>
    %68 = vector.extract_strided_slice %60 {offsets = [0, 0, 48], sizes = [2, 8, 8], strides = [1, 1, 1]} : vector<2x8x96xbf16> to vector<2x8x8xbf16>
    %69 = vector.extract_strided_slice %60 {offsets = [0, 0, 56], sizes = [2, 8, 8], strides = [1, 1, 1]} : vector<2x8x96xbf16> to vector<2x8x8xbf16>
    %70 = tpu.concatenate %66, %67, %68, %69 in 0 : vector<2x8x8xbf16>, vector<2x8x8xbf16>, vector<2x8x8xbf16>, vector<2x8x8xbf16> -> vector<8x8x8xbf16>
    %71 = vector.extract_strided_slice %60 {offsets = [0, 0, 64], sizes = [2, 8, 8], strides = [1, 1, 1]} : vector<2x8x96xbf16> to vector<2x8x8xbf16>
    %72 = vector.extract_strided_slice %60 {offsets = [0, 0, 72], sizes = [2, 8, 8], strides = [1, 1, 1]} : vector<2x8x96xbf16> to vector<2x8x8xbf16>
    %73 = vector.extract_strided_slice %60 {offsets = [0, 0, 80], sizes = [2, 8, 8], strides = [1, 1, 1]} : vector<2x8x96xbf16> to vector<2x8x8xbf16>
    %74 = vector.extract_strided_slice %60 {offsets = [0, 0, 88], sizes = [2, 8, 8], strides = [1, 1, 1]} : vector<2x8x96xbf16> to vector<2x8x8xbf16>
    %75 = tpu.concatenate %71, %72, %73, %74 in 0 : vector<2x8x8xbf16>, vector<2x8x8xbf16>, vector<2x8x8xbf16>, vector<2x8x8xbf16> -> vector<8x8x8xbf16>
    "tpu.trace_start"() <{level = 10 : i32, message = "bqd,bkd->bqk"}> : () -> ()
    %cst_27 = arith.constant dense<0.000000e+00> : vector<8x8x8xf32>
    %76 = tpu.matmul %65, %70, %cst_27 {dimension_numbers = #tpu.dot_dimension_numbers<[2], [2], [1], [1], [0, 0, 0, 1, 1, 1], [0], [0]>} : vector<8x8x8xbf16>, vector<8x8x8xbf16>, vector<8x8x8xf32> -> vector<8x8x8xf32>
    "tpu.trace_stop"() : () -> ()
    %cst_28 = arith.constant 0.353553385 : f32
    %77 = vector.broadcast %cst_28 : f32 to vector<8x8x8xf32>
    %78 = arith.mulf %76, %77 : vector<8x8x8xf32>
    %79 = arith.addf %78, %8 : vector<8x8x8xf32>
    %cst_29 = arith.constant dense<0xFF800000> : vector<8x8xf32>
    %80 = vector.multi_reduction <maximumf>, %79, %cst_29 [2] : vector<8x8x8xf32> to vector<8x8xf32>
    %81 = vector.shape_cast %80 : vector<8x8xf32> to vector<8x8x1xf32>
    %82 = vector.broadcast %81 : vector<8x8x1xf32> to vector<8x8x8xf32>
    %83 = arith.subf %79, %82 : vector<8x8x8xf32>
    %84 = math.exp %83 : vector<8x8x8xf32>
    %cst_30 = arith.constant dense<0.000000e+00> : vector<8x8xf32>
    %85 = vector.multi_reduction <add>, %84, %cst_30 [2] : vector<8x8x8xf32> to vector<8x8xf32>
    %86 = vector.shape_cast %85 : vector<8x8xf32> to vector<8x8x1xf32>
    %87 = tpu.reciprocal %86 {approx = true} : vector<8x8x1xf32> -> vector<8x8x1xf32>
    %88 = vector.broadcast %87 : vector<8x8x1xf32> to vector<8x8x8xf32>
    %89 = arith.mulf %84, %88 : vector<8x8x8xf32>
    %90 = arith.truncf %89 : vector<8x8x8xf32> to vector<8x8x8xbf16>
    "tpu.trace_start"() <{level = 10 : i32, message = "bqk,bkd->bqd"}> : () -> ()
    %cst_31 = arith.constant dense<0.000000e+00> : vector<8x8x8xf32>
    %91 = tpu.matmul %90, %75, %cst_31 {dimension_numbers = #tpu.dot_dimension_numbers<[2], [1], [1], [2], [0, 0, 0, 1, 1, 2], [0], [0]>} : vector<8x8x8xbf16>, vector<8x8x8xbf16>, vector<8x8x8xf32> -> vector<8x8x8xf32>
    "tpu.trace_stop"() : () -> ()
    %92 = vector.extract_strided_slice %91 {offsets = [0, 0, 0], sizes = [2, 8, 8], strides = [1, 1, 1]} : vector<8x8x8xf32> to vector<2x8x8xf32>
    %93 = vector.extract_strided_slice %91 {offsets = [2, 0, 0], sizes = [2, 8, 8], strides = [1, 1, 1]} : vector<8x8x8xf32> to vector<2x8x8xf32>
    %94 = vector.extract_strided_slice %91 {offsets = [4, 0, 0], sizes = [2, 8, 8], strides = [1, 1, 1]} : vector<8x8x8xf32> to vector<2x8x8xf32>
    %95 = vector.extract_strided_slice %91 {offsets = [6, 0, 0], sizes = [2, 8, 8], strides = [1, 1, 1]} : vector<8x8x8xf32> to vector<2x8x8xf32>
    %96 = tpu.concatenate %92, %93, %94, %95 in 2 : vector<2x8x8xf32>, vector<2x8x8xf32>, vector<2x8x8xf32>, vector<2x8x8xf32> -> vector<2x8x32xf32>
    %97 = vector.shape_cast %96 : vector<2x8x32xf32> to vector<16x32xf32>
    %98 = arith.truncf %97 : vector<16x32xf32> to vector<16x32xbf16>
    %c0_32 = arith.constant 0 : index
    %c0_33 = arith.constant 0 : index
    %c0_34 = arith.constant 0 : index
    %99 = vector.load %arg9[%c0_32, %c0_33, %c0_34] : memref<2x32x32xbf16, #tpu.memory_space<vmem>>, vector<1x32x32xbf16>
    %100 = vector.shape_cast %99 : vector<1x32x32xbf16> to vector<32x32xbf16>
    %cst_35 = arith.constant dense<0.000000e+00> : vector<16x32xf32>
    %101 = tpu.matmul %98, %100, %cst_35 {dimension_numbers = #tpu.dot_dimension_numbers<[1], [0], [0], [1], [0, 0, 1, 1], [], []>} : vector<16x32xbf16>, vector<32x32xbf16>, vector<16x32xf32> -> vector<16x32xf32>
    %c0_36 = arith.constant 0 : index
    %c0_37 = arith.constant 0 : index
    %c0_38 = arith.constant 0 : index
    %102 = vector.load %arg10[%c0_36, %c0_37, %c0_38] : memref<2x1x32xf32, #tpu.memory_space<vmem>>, vector<1x1x32xf32>
    %103 = vector.shape_cast %102 : vector<1x1x32xf32> to vector<1x32xf32>
    %104 = vector.broadcast %103 : vector<1x32xf32> to vector<16x32xf32>
    %105 = arith.addf %101, %104 : vector<16x32xf32>
    %106 = arith.addf %50, %105 : vector<16x32xf32>
    %c0_39 = arith.constant 0 : index
    %c0_40 = arith.constant 0 : index
    %c0_41 = arith.constant 0 : index
    %107 = vector.load %arg11[%c0_39, %c0_40, %c0_41] : memref<2x1x32xf32, #tpu.memory_space<vmem>>, vector<1x1x32xf32>
    %108 = vector.shape_cast %107 : vector<1x1x32xf32> to vector<1x32xf32>
    %c0_42 = arith.constant 0 : index
    %c0_43 = arith.constant 0 : index
    %c0_44 = arith.constant 0 : index
    %109 = vector.load %arg12[%c0_42, %c0_43, %c0_44] : memref<2x1x32xf32, #tpu.memory_space<vmem>>, vector<1x1x32xf32>
    %110 = vector.shape_cast %109 : vector<1x1x32xf32> to vector<1x32xf32>
    %cst_45 = arith.constant dense<0.000000e+00> : vector<16xf32>
    %111 = vector.multi_reduction <add>, %106, %cst_45 [1] : vector<16x32xf32> to vector<16xf32>
    %112 = vector.shape_cast %111 : vector<16xf32> to vector<16x1xf32>
    %cst_46 = arith.constant 3.200000e+01 : f32
    %113 = vector.broadcast %cst_46 : f32 to vector<16x1xf32>
    %114 = arith.divf %112, %113 : vector<16x1xf32>
    %115 = vector.broadcast %114 : vector<16x1xf32> to vector<16x32xf32>
    %116 = arith.subf %106, %115 : vector<16x32xf32>
    %117 = arith.mulf %116, %116 : vector<16x32xf32>
    %cst_47 = arith.constant dense<0.000000e+00> : vector<16xf32>
    %118 = vector.multi_reduction <add>, %117, %cst_47 [1] : vector<16x32xf32> to vector<16xf32>
    %119 = vector.shape_cast %118 : vector<16xf32> to vector<16x1xf32>
    %cst_48 = arith.constant 3.200000e+01 : f32
    %120 = vector.broadcast %cst_48 : f32 to vector<16x1xf32>
    %121 = arith.divf %119, %120 : vector<16x1xf32>
    %122 = vector.broadcast %114 : vector<16x1xf32> to vector<16x32xf32>
    %123 = arith.subf %106, %122 : vector<16x32xf32>
    %cst_49 = arith.constant 9.99999996E-13 : f32
    %124 = vector.broadcast %cst_49 : f32 to vector<16x1xf32>
    %125 = arith.addf %121, %124 : vector<16x1xf32>
    %126 = math.rsqrt %125 : vector<16x1xf32>
    %127 = vector.broadcast %126 : vector<16x1xf32> to vector<16x32xf32>
    %128 = arith.mulf %123, %127 : vector<16x32xf32>
    %129 = vector.broadcast %108 : vector<1x32xf32> to vector<16x32xf32>
    %130 = arith.mulf %128, %129 : vector<16x32xf32>
    %131 = vector.broadcast %110 : vector<1x32xf32> to vector<16x32xf32>
    %132 = arith.addf %130, %131 : vector<16x32xf32>
    %133 = arith.truncf %132 : vector<16x32xf32> to vector<16x32xbf16>
    %c0_50 = arith.constant 0 : index
    %c0_51 = arith.constant 0 : index
    %c0_52 = arith.constant 0 : index
    %134 = vector.load %arg13[%c0_50, %c0_51, %c0_52] : memref<2x32x64xbf16, #tpu.memory_space<vmem>>, vector<1x32x64xbf16>
    %135 = vector.shape_cast %134 : vector<1x32x64xbf16> to vector<32x64xbf16>
    %cst_53 = arith.constant dense<0.000000e+00> : vector<16x64xf32>
    %136 = tpu.matmul %133, %135, %cst_53 {dimension_numbers = #tpu.dot_dimension_numbers<[1], [0], [0], [1], [0, 0, 1, 1], [], []>} : vector<16x32xbf16>, vector<32x64xbf16>, vector<16x64xf32> -> vector<16x64xf32>
    %c0_54 = arith.constant 0 : index
    %c0_55 = arith.constant 0 : index
    %c0_56 = arith.constant 0 : index
    %137 = vector.load %arg14[%c0_54, %c0_55, %c0_56] : memref<2x1x64xf32, #tpu.memory_space<vmem>>, vector<1x1x64xf32>
    %138 = vector.shape_cast %137 : vector<1x1x64xf32> to vector<1x64xf32>
    %139 = vector.broadcast %138 : vector<1x64xf32> to vector<16x64xf32>
    %140 = arith.addf %136, %139 : vector<16x64xf32>
    %cst_57 = arith.constant 5.000000e-01 : f32
    %141 = vector.broadcast %cst_57 : f32 to vector<16x64xf32>
    %142 = arith.mulf %141, %140 : vector<16x64xf32>
    %cst_58 = arith.constant 4.471500e-02 : f32
    %143 = vector.broadcast %cst_58 : f32 to vector<16x64xf32>
    %144 = arith.mulf %143, %140 : vector<16x64xf32>
    %145 = arith.mulf %144, %140 : vector<16x64xf32>
    %146 = arith.mulf %145, %140 : vector<16x64xf32>
    %147 = arith.addf %140, %146 : vector<16x64xf32>
    %cst_59 = arith.constant 0.797884583 : f32
    %148 = vector.broadcast %cst_59 : f32 to vector<16x64xf32>
    %149 = arith.mulf %148, %147 : vector<16x64xf32>
    %150 = math.tanh %149 : vector<16x64xf32>
    %cst_60 = arith.constant 1.000000e+00 : f32
    %151 = vector.broadcast %cst_60 : f32 to vector<16x64xf32>
    %152 = arith.addf %151, %150 : vector<16x64xf32>
    %153 = arith.mulf %142, %152 : vector<16x64xf32>
    %154 = arith.truncf %153 : vector<16x64xf32> to vector<16x64xbf16>
    %c0_61 = arith.constant 0 : index
    %c0_62 = arith.constant 0 : index
    %c0_63 = arith.constant 0 : index
    %155 = vector.load %arg15[%c0_61, %c0_62, %c0_63] : memref<2x64x32xbf16, #tpu.memory_space<vmem>>, vector<1x64x32xbf16>
    %156 = vector.shape_cast %155 : vector<1x64x32xbf16> to vector<64x32xbf16>
    %cst_64 = arith.constant dense<0.000000e+00> : vector<16x32xf32>
    %157 = tpu.matmul %154, %156, %cst_64 {dimension_numbers = #tpu.dot_dimension_numbers<[1], [0], [0], [1], [0, 0, 1, 1], [], []>} : vector<16x64xbf16>, vector<64x32xbf16>, vector<16x32xf32> -> vector<16x32xf32>
    %c0_65 = arith.constant 0 : index
    %c0_66 = arith.constant 0 : index
    %c0_67 = arith.constant 0 : index
    %158 = vector.load %arg16[%c0_65, %c0_66, %c0_67] : memref<2x1x32xf32, #tpu.memory_space<vmem>>, vector<1x1x32xf32>
    %159 = vector.shape_cast %158 : vector<1x1x32xf32> to vector<1x32xf32>
    %160 = vector.broadcast %159 : vector<1x32xf32> to vector<16x32xf32>
    %161 = arith.addf %157, %160 : vector<16x32xf32>
    %162 = arith.addf %132, %161 : vector<16x32xf32>
    %c0_68 = arith.constant 0 : index
    %c0_69 = arith.constant 0 : index
    %c0_70 = arith.constant 0 : index
    %163 = vector.load %arg17[%c0_68, %c0_69, %c0_70] : memref<2x1x32xf32, #tpu.memory_space<vmem>>, vector<1x1x32xf32>
    %164 = vector.shape_cast %163 : vector<1x1x32xf32> to vector<1x32xf32>
    %c0_71 = arith.constant 0 : index
    %c0_72 = arith.constant 0 : index
    %c0_73 = arith.constant 0 : index
    %165 = vector.load %arg18[%c0_71, %c0_72, %c0_73] : memref<2x1x32xf32, #tpu.memory_space<vmem>>, vector<1x1x32xf32>
    %166 = vector.shape_cast %165 : vector<1x1x32xf32> to vector<1x32xf32>
    %cst_74 = arith.constant dense<0.000000e+00> : vector<16xf32>
    %167 = vector.multi_reduction <add>, %162, %cst_74 [1] : vector<16x32xf32> to vector<16xf32>
    %168 = vector.shape_cast %167 : vector<16xf32> to vector<16x1xf32>
    %cst_75 = arith.constant 3.200000e+01 : f32
    %169 = vector.broadcast %cst_75 : f32 to vector<16x1xf32>
    %170 = arith.divf %168, %169 : vector<16x1xf32>
    %171 = vector.broadcast %170 : vector<16x1xf32> to vector<16x32xf32>
    %172 = arith.subf %162, %171 : vector<16x32xf32>
    %173 = arith.mulf %172, %172 : vector<16x32xf32>
    %cst_76 = arith.constant dense<0.000000e+00> : vector<16xf32>
    %174 = vector.multi_reduction <add>, %173, %cst_76 [1] : vector<16x32xf32> to vector<16xf32>
    %175 = vector.shape_cast %174 : vector<16xf32> to vector<16x1xf32>
    %cst_77 = arith.constant 3.200000e+01 : f32
    %176 = vector.broadcast %cst_77 : f32 to vector<16x1xf32>
    %177 = arith.divf %175, %176 : vector<16x1xf32>
    %178 = vector.broadcast %170 : vector<16x1xf32> to vector<16x32xf32>
    %179 = arith.subf %162, %178 : vector<16x32xf32>
    %cst_78 = arith.constant 9.99999996E-13 : f32
    %180 = vector.broadcast %cst_78 : f32 to vector<16x1xf32>
    %181 = arith.addf %177, %180 : vector<16x1xf32>
    %182 = math.rsqrt %181 : vector<16x1xf32>
    %183 = vector.broadcast %182 : vector<16x1xf32> to vector<16x32xf32>
    %184 = arith.mulf %179, %183 : vector<16x32xf32>
    %185 = vector.broadcast %164 : vector<1x32xf32> to vector<16x32xf32>
    %186 = arith.mulf %184, %185 : vector<16x32xf32>
    %187 = vector.broadcast %166 : vector<1x32xf32> to vector<16x32xf32>
    %188 = arith.addf %186, %187 : vector<16x32xf32>
    %189 = arith.truncf %188 : vector<16x32xf32> to vector<16x32xbf16>
    %c1 = arith.constant 1 : index
    %c0_79 = arith.constant 0 : index
    %c0_80 = arith.constant 0 : index
    %190 = vector.load %arg7[%c1, %c0_79, %c0_80] : memref<2x32x96xbf16, #tpu.memory_space<vmem>>, vector<1x32x96xbf16>
    %191 = vector.shape_cast %190 : vector<1x32x96xbf16> to vector<32x96xbf16>
    %cst_81 = arith.constant dense<0.000000e+00> : vector<16x96xf32>
    %192 = tpu.matmul %189, %191, %cst_81 {dimension_numbers = #tpu.dot_dimension_numbers<[1], [0], [0], [1], [0, 0, 1, 1], [], []>} : vector<16x32xbf16>, vector<32x96xbf16>, vector<16x96xf32> -> vector<16x96xf32>
    %c1_82 = arith.constant 1 : index
    %c0_83 = arith.constant 0 : index
    %c0_84 = arith.constant 0 : index
    %193 = vector.load %arg8[%c1_82, %c0_83, %c0_84] : memref<2x1x96xf32, #tpu.memory_space<vmem>>, vector<1x1x96xf32>
    %194 = vector.shape_cast %193 : vector<1x1x96xf32> to vector<1x96xf32>
    %195 = vector.broadcast %194 : vector<1x96xf32> to vector<16x96xf32>
    %196 = arith.addf %192, %195 : vector<16x96xf32>
    %197 = vector.shape_cast %196 : vector<16x96xf32> to vector<2x8x96xf32>
    %198 = arith.truncf %197 : vector<2x8x96xf32> to vector<2x8x96xbf16>
    %199 = vector.extract_strided_slice %198 {offsets = [0, 0, 0], sizes = [2, 8, 8], strides = [1, 1, 1]} : vector<2x8x96xbf16> to vector<2x8x8xbf16>
    %200 = vector.extract_strided_slice %198 {offsets = [0, 0, 8], sizes = [2, 8, 8], strides = [1, 1, 1]} : vector<2x8x96xbf16> to vector<2x8x8xbf16>
    %201 = vector.extract_strided_slice %198 {offsets = [0, 0, 16], sizes = [2, 8, 8], strides = [1, 1, 1]} : vector<2x8x96xbf16> to vector<2x8x8xbf16>
    %202 = vector.extract_strided_slice %198 {offsets = [0, 0, 24], sizes = [2, 8, 8], strides = [1, 1, 1]} : vector<2x8x96xbf16> to vector<2x8x8xbf16>
    %203 = tpu.concatenate %199, %200, %201, %202 in 0 : vector<2x8x8xbf16>, vector<2x8x8xbf16>, vector<2x8x8xbf16>, vector<2x8x8xbf16> -> vector<8x8x8xbf16>
    %204 = vector.extract_strided_slice %198 {offsets = [0, 0, 32], sizes = [2, 8, 8], strides = [1, 1, 1]} : vector<2x8x96xbf16> to vector<2x8x8xbf16>
    %205 = vector.extract_strided_slice %198 {offsets = [0, 0, 40], sizes = [2, 8, 8], strides = [1, 1, 1]} : vector<2x8x96xbf16> to vector<2x8x8xbf16>
    %206 = vector.extract_strided_slice %198 {offsets = [0, 0, 48], sizes = [2, 8, 8], strides = [1, 1, 1]} : vector<2x8x96xbf16> to vector<2x8x8xbf16>
    %207 = vector.extract_strided_slice %198 {offsets = [0, 0, 56], sizes = [2, 8, 8], strides = [1, 1, 1]} : vector<2x8x96xbf16> to vector<2x8x8xbf16>
    %208 = tpu.concatenate %204, %205, %206, %207 in 0 : vector<2x8x8xbf16>, vector<2x8x8xbf16>, vector<2x8x8xbf16>, vector<2x8x8xbf16> -> vector<8x8x8xbf16>
    %209 = vector.extract_strided_slice %198 {offsets = [0, 0, 64], sizes = [2, 8, 8], strides = [1, 1, 1]} : vector<2x8x96xbf16> to vector<2x8x8xbf16>
    %210 = vector.extract_strided_slice %198 {offsets = [0, 0, 72], sizes = [2, 8, 8], strides = [1, 1, 1]} : vector<2x8x96xbf16> to vector<2x8x8xbf16>
    %211 = vector.extract_strided_slice %198 {offsets = [0, 0, 80], sizes = [2, 8, 8], strides = [1, 1, 1]} : vector<2x8x96xbf16> to vector<2x8x8xbf16>
    %212 = vector.extract_strided_slice %198 {offsets = [0, 0, 88], sizes = [2, 8, 8], strides = [1, 1, 1]} : vector<2x8x96xbf16> to vector<2x8x8xbf16>
    %213 = tpu.concatenate %209, %210, %211, %212 in 0 : vector<2x8x8xbf16>, vector<2x8x8xbf16>, vector<2x8x8xbf16>, vector<2x8x8xbf16> -> vector<8x8x8xbf16>
    "tpu.trace_start"() <{level = 10 : i32, message = "bqd,bkd->bqk"}> : () -> ()
    %cst_85 = arith.constant dense<0.000000e+00> : vector<8x8x8xf32>
    %214 = tpu.matmul %203, %208, %cst_85 {dimension_numbers = #tpu.dot_dimension_numbers<[2], [2], [1], [1], [0, 0, 0, 1, 1, 1], [0], [0]>} : vector<8x8x8xbf16>, vector<8x8x8xbf16>, vector<8x8x8xf32> -> vector<8x8x8xf32>
    "tpu.trace_stop"() : () -> ()
    %cst_86 = arith.constant 0.353553385 : f32
    %215 = vector.broadcast %cst_86 : f32 to vector<8x8x8xf32>
    %216 = arith.mulf %214, %215 : vector<8x8x8xf32>
    %217 = arith.addf %216, %8 : vector<8x8x8xf32>
    %cst_87 = arith.constant dense<0xFF800000> : vector<8x8xf32>
    %218 = vector.multi_reduction <maximumf>, %217, %cst_87 [2] : vector<8x8x8xf32> to vector<8x8xf32>
    %219 = vector.shape_cast %218 : vector<8x8xf32> to vector<8x8x1xf32>
    %220 = vector.broadcast %219 : vector<8x8x1xf32> to vector<8x8x8xf32>
    %221 = arith.subf %217, %220 : vector<8x8x8xf32>
    %222 = math.exp %221 : vector<8x8x8xf32>
    %cst_88 = arith.constant dense<0.000000e+00> : vector<8x8xf32>
    %223 = vector.multi_reduction <add>, %222, %cst_88 [2] : vector<8x8x8xf32> to vector<8x8xf32>
    %224 = vector.shape_cast %223 : vector<8x8xf32> to vector<8x8x1xf32>
    %225 = tpu.reciprocal %224 {approx = true} : vector<8x8x1xf32> -> vector<8x8x1xf32>
    %226 = vector.broadcast %225 : vector<8x8x1xf32> to vector<8x8x8xf32>
    %227 = arith.mulf %222, %226 : vector<8x8x8xf32>
    %228 = arith.truncf %227 : vector<8x8x8xf32> to vector<8x8x8xbf16>
    "tpu.trace_start"() <{level = 10 : i32, message = "bqk,bkd->bqd"}> : () -> ()
    %cst_89 = arith.constant dense<0.000000e+00> : vector<8x8x8xf32>
    %229 = tpu.matmul %228, %213, %cst_89 {dimension_numbers = #tpu.dot_dimension_numbers<[2], [1], [1], [2], [0, 0, 0, 1, 1, 2], [0], [0]>} : vector<8x8x8xbf16>, vector<8x8x8xbf16>, vector<8x8x8xf32> -> vector<8x8x8xf32>
    "tpu.trace_stop"() : () -> ()
    %230 = vector.extract_strided_slice %229 {offsets = [0, 0, 0], sizes = [2, 8, 8], strides = [1, 1, 1]} : vector<8x8x8xf32> to vector<2x8x8xf32>
    %231 = vector.extract_strided_slice %229 {offsets = [2, 0, 0], sizes = [2, 8, 8], strides = [1, 1, 1]} : vector<8x8x8xf32> to vector<2x8x8xf32>
    %232 = vector.extract_strided_slice %229 {offsets = [4, 0, 0], sizes = [2, 8, 8], strides = [1, 1, 1]} : vector<8x8x8xf32> to vector<2x8x8xf32>
    %233 = vector.extract_strided_slice %229 {offsets = [6, 0, 0], sizes = [2, 8, 8], strides = [1, 1, 1]} : vector<8x8x8xf32> to vector<2x8x8xf32>
    %234 = tpu.concatenate %230, %231, %232, %233 in 2 : vector<2x8x8xf32>, vector<2x8x8xf32>, vector<2x8x8xf32>, vector<2x8x8xf32> -> vector<2x8x32xf32>
    %235 = vector.shape_cast %234 : vector<2x8x32xf32> to vector<16x32xf32>
    %236 = arith.truncf %235 : vector<16x32xf32> to vector<16x32xbf16>
    %c1_90 = arith.constant 1 : index
    %c0_91 = arith.constant 0 : index
    %c0_92 = arith.constant 0 : index
    %237 = vector.load %arg9[%c1_90, %c0_91, %c0_92] : memref<2x32x32xbf16, #tpu.memory_space<vmem>>, vector<1x32x32xbf16>
    %238 = vector.shape_cast %237 : vector<1x32x32xbf16> to vector<32x32xbf16>
    %cst_93 = arith.constant dense<0.000000e+00> : vector<16x32xf32>
    %239 = tpu.matmul %236, %238, %cst_93 {dimension_numbers = #tpu.dot_dimension_numbers<[1], [0], [0], [1], [0, 0, 1, 1], [], []>} : vector<16x32xbf16>, vector<32x32xbf16>, vector<16x32xf32> -> vector<16x32xf32>
    %c1_94 = arith.constant 1 : index
    %c0_95 = arith.constant 0 : index
    %c0_96 = arith.constant 0 : index
    %240 = vector.load %arg10[%c1_94, %c0_95, %c0_96] : memref<2x1x32xf32, #tpu.memory_space<vmem>>, vector<1x1x32xf32>
    %241 = vector.shape_cast %240 : vector<1x1x32xf32> to vector<1x32xf32>
    %242 = vector.broadcast %241 : vector<1x32xf32> to vector<16x32xf32>
    %243 = arith.addf %239, %242 : vector<16x32xf32>
    %244 = arith.addf %188, %243 : vector<16x32xf32>
    %c1_97 = arith.constant 1 : index
    %c0_98 = arith.constant 0 : index
    %c0_99 = arith.constant 0 : index
    %245 = vector.load %arg11[%c1_97, %c0_98, %c0_99] : memref<2x1x32xf32, #tpu.memory_space<vmem>>, vector<1x1x32xf32>
    %246 = vector.shape_cast %245 : vector<1x1x32xf32> to vector<1x32xf32>
    %c1_100 = arith.constant 1 : index
    %c0_101 = arith.constant 0 : index
    %c0_102 = arith.constant 0 : index
    %247 = vector.load %arg12[%c1_100, %c0_101, %c0_102] : memref<2x1x32xf32, #tpu.memory_space<vmem>>, vector<1x1x32xf32>
    %248 = vector.shape_cast %247 : vector<1x1x32xf32> to vector<1x32xf32>
    %cst_103 = arith.constant dense<0.000000e+00> : vector<16xf32>
    %249 = vector.multi_reduction <add>, %244, %cst_103 [1] : vector<16x32xf32> to vector<16xf32>
    %250 = vector.shape_cast %249 : vector<16xf32> to vector<16x1xf32>
    %cst_104 = arith.constant 3.200000e+01 : f32
    %251 = vector.broadcast %cst_104 : f32 to vector<16x1xf32>
    %252 = arith.divf %250, %251 : vector<16x1xf32>
    %253 = vector.broadcast %252 : vector<16x1xf32> to vector<16x32xf32>
    %254 = arith.subf %244, %253 : vector<16x32xf32>
    %255 = arith.mulf %254, %254 : vector<16x32xf32>
    %cst_105 = arith.constant dense<0.000000e+00> : vector<16xf32>
    %256 = vector.multi_reduction <add>, %255, %cst_105 [1] : vector<16x32xf32> to vector<16xf32>
    %257 = vector.shape_cast %256 : vector<16xf32> to vector<16x1xf32>
    %cst_106 = arith.constant 3.200000e+01 : f32
    %258 = vector.broadcast %cst_106 : f32 to vector<16x1xf32>
    %259 = arith.divf %257, %258 : vector<16x1xf32>
    %260 = vector.broadcast %252 : vector<16x1xf32> to vector<16x32xf32>
    %261 = arith.subf %244, %260 : vector<16x32xf32>
    %cst_107 = arith.constant 9.99999996E-13 : f32
    %262 = vector.broadcast %cst_107 : f32 to vector<16x1xf32>
    %263 = arith.addf %259, %262 : vector<16x1xf32>
    %264 = math.rsqrt %263 : vector<16x1xf32>
    %265 = vector.broadcast %264 : vector<16x1xf32> to vector<16x32xf32>
    %266 = arith.mulf %261, %265 : vector<16x32xf32>
    %267 = vector.broadcast %246 : vector<1x32xf32> to vector<16x32xf32>
    %268 = arith.mulf %266, %267 : vector<16x32xf32>
    %269 = vector.broadcast %248 : vector<1x32xf32> to vector<16x32xf32>
    %270 = arith.addf %268, %269 : vector<16x32xf32>
    %271 = arith.truncf %270 : vector<16x32xf32> to vector<16x32xbf16>
    %c1_108 = arith.constant 1 : index
    %c0_109 = arith.constant 0 : index
    %c0_110 = arith.constant 0 : index
    %272 = vector.load %arg13[%c1_108, %c0_109, %c0_110] : memref<2x32x64xbf16, #tpu.memory_space<vmem>>, vector<1x32x64xbf16>
    %273 = vector.shape_cast %272 : vector<1x32x64xbf16> to vector<32x64xbf16>
    %cst_111 = arith.constant dense<0.000000e+00> : vector<16x64xf32>
    %274 = tpu.matmul %271, %273, %cst_111 {dimension_numbers = #tpu.dot_dimension_numbers<[1], [0], [0], [1], [0, 0, 1, 1], [], []>} : vector<16x32xbf16>, vector<32x64xbf16>, vector<16x64xf32> -> vector<16x64xf32>
    %c1_112 = arith.constant 1 : index
    %c0_113 = arith.constant 0 : index
    %c0_114 = arith.constant 0 : index
    %275 = vector.load %arg14[%c1_112, %c0_113, %c0_114] : memref<2x1x64xf32, #tpu.memory_space<vmem>>, vector<1x1x64xf32>
    %276 = vector.shape_cast %275 : vector<1x1x64xf32> to vector<1x64xf32>
    %277 = vector.broadcast %276 : vector<1x64xf32> to vector<16x64xf32>
    %278 = arith.addf %274, %277 : vector<16x64xf32>
    %cst_115 = arith.constant 5.000000e-01 : f32
    %279 = vector.broadcast %cst_115 : f32 to vector<16x64xf32>
    %280 = arith.mulf %279, %278 : vector<16x64xf32>
    %cst_116 = arith.constant 4.471500e-02 : f32
    %281 = vector.broadcast %cst_116 : f32 to vector<16x64xf32>
    %282 = arith.mulf %281, %278 : vector<16x64xf32>
    %283 = arith.mulf %282, %278 : vector<16x64xf32>
    %284 = arith.mulf %283, %278 : vector<16x64xf32>
    %285 = arith.addf %278, %284 : vector<16x64xf32>
    %cst_117 = arith.constant 0.797884583 : f32
    %286 = vector.broadcast %cst_117 : f32 to vector<16x64xf32>
    %287 = arith.mulf %286, %285 : vector<16x64xf32>
    %288 = math.tanh %287 : vector<16x64xf32>
    %cst_118 = arith.constant 1.000000e+00 : f32
    %289 = vector.broadcast %cst_118 : f32 to vector<16x64xf32>
    %290 = arith.addf %289, %288 : vector<16x64xf32>
    %291 = arith.mulf %280, %290 : vector<16x64xf32>
    %292 = arith.truncf %291 : vector<16x64xf32> to vector<16x64xbf16>
    %c1_119 = arith.constant 1 : index
    %c0_120 = arith.constant 0 : index
    %c0_121 = arith.constant 0 : index
    %293 = vector.load %arg15[%c1_119, %c0_120, %c0_121] : memref<2x64x32xbf16, #tpu.memory_space<vmem>>, vector<1x64x32xbf16>
    %294 = vector.shape_cast %293 : vector<1x64x32xbf16> to vector<64x32xbf16>
    %cst_122 = arith.constant dense<0.000000e+00> : vector<16x32xf32>
    %295 = tpu.matmul %292, %294, %cst_122 {dimension_numbers = #tpu.dot_dimension_numbers<[1], [0], [0], [1], [0, 0, 1, 1], [], []>} : vector<16x64xbf16>, vector<64x32xbf16>, vector<16x32xf32> -> vector<16x32xf32>
    %c1_123 = arith.constant 1 : index
    %c0_124 = arith.constant 0 : index
    %c0_125 = arith.constant 0 : index
    %296 = vector.load %arg16[%c1_123, %c0_124, %c0_125] : memref<2x1x32xf32, #tpu.memory_space<vmem>>, vector<1x1x32xf32>
    %297 = vector.shape_cast %296 : vector<1x1x32xf32> to vector<1x32xf32>
    %298 = vector.broadcast %297 : vector<1x32xf32> to vector<16x32xf32>
    %299 = arith.addf %295, %298 : vector<16x32xf32>
    %300 = arith.addf %270, %299 : vector<16x32xf32>
    %c1_126 = arith.constant 1 : index
    %c0_127 = arith.constant 0 : index
    %c0_128 = arith.constant 0 : index
    %301 = vector.load %arg17[%c1_126, %c0_127, %c0_128] : memref<2x1x32xf32, #tpu.memory_space<vmem>>, vector<1x1x32xf32>
    %302 = vector.shape_cast %301 : vector<1x1x32xf32> to vector<1x32xf32>
    %c1_129 = arith.constant 1 : index
    %c0_130 = arith.constant 0 : index
    %c0_131 = arith.constant 0 : index
    %303 = vector.load %arg18[%c1_129, %c0_130, %c0_131] : memref<2x1x32xf32, #tpu.memory_space<vmem>>, vector<1x1x32xf32>
    %304 = vector.shape_cast %303 : vector<1x1x32xf32> to vector<1x32xf32>
    %cst_132 = arith.constant dense<0.000000e+00> : vector<16xf32>
    %305 = vector.multi_reduction <add>, %300, %cst_132 [1] : vector<16x32xf32> to vector<16xf32>
    %306 = vector.shape_cast %305 : vector<16xf32> to vector<16x1xf32>
    %cst_133 = arith.constant 3.200000e+01 : f32
    %307 = vector.broadcast %cst_133 : f32 to vector<16x1xf32>
    %308 = arith.divf %306, %307 : vector<16x1xf32>
    %309 = vector.broadcast %308 : vector<16x1xf32> to vector<16x32xf32>
    %310 = arith.subf %300, %309 : vector<16x32xf32>
    %311 = arith.mulf %310, %310 : vector<16x32xf32>
    %cst_134 = arith.constant dense<0.000000e+00> : vector<16xf32>
    %312 = vector.multi_reduction <add>, %311, %cst_134 [1] : vector<16x32xf32> to vector<16xf32>
    %313 = vector.shape_cast %312 : vector<16xf32> to vector<16x1xf32>
    %cst_135 = arith.constant 3.200000e+01 : f32
    %314 = vector.broadcast %cst_135 : f32 to vector<16x1xf32>
    %315 = arith.divf %313, %314 : vector<16x1xf32>
    %316 = vector.broadcast %308 : vector<16x1xf32> to vector<16x32xf32>
    %317 = arith.subf %300, %316 : vector<16x32xf32>
    %cst_136 = arith.constant 9.99999996E-13 : f32
    %318 = vector.broadcast %cst_136 : f32 to vector<16x1xf32>
    %319 = arith.addf %315, %318 : vector<16x1xf32>
    %320 = math.rsqrt %319 : vector<16x1xf32>
    %321 = vector.broadcast %320 : vector<16x1xf32> to vector<16x32xf32>
    %322 = arith.mulf %317, %321 : vector<16x32xf32>
    %323 = vector.broadcast %302 : vector<1x32xf32> to vector<16x32xf32>
    %324 = arith.mulf %322, %323 : vector<16x32xf32>
    %325 = vector.broadcast %304 : vector<1x32xf32> to vector<16x32xf32>
    %326 = arith.addf %324, %325 : vector<16x32xf32>
    %327 = vector.shape_cast %326 : vector<16x32xf32> to vector<2x8x32xf32>
    %328 = vector.shape_cast %0 : vector<2x8xf32> to vector<2x8x1xf32>
    %329 = vector.broadcast %328 : vector<2x8x1xf32> to vector<2x8x32xf32>
    %330 = arith.mulf %327, %329 : vector<2x8x32xf32>
    %cst_137 = arith.constant dense<0.000000e+00> : vector<2x32xf32>
    %331 = vector.multi_reduction <add>, %330, %cst_137 [1] : vector<2x8x32xf32> to vector<2x32xf32>
    %332 = vector.shape_cast %0 : vector<2x8xf32> to vector<1x2x8xf32>
    %cst_138 = arith.constant dense<0.000000e+00> : vector<1xf32>
    %333 = vector.multi_reduction <add>, %332, %cst_138 [1, 2] : vector<1x2x8xf32> to vector<1xf32>
    %334 = vector.shape_cast %333 : vector<1xf32> to vector<1x1x1xf32>
    %335 = vector.extract %334[0, 0, 0] : f32 from vector<1x1x1xf32>
    %336 = vector.broadcast %335 : f32 to vector<2x32xf32>
    %337 = arith.divf %331, %336 : vector<2x32xf32>
    %338 = arith.truncf %337 : vector<2x32xf32> to vector<2x32xbf16>
    %c0_139 = arith.constant 0 : index
    %c0_140 = arith.constant 0 : index
    %339 = vector.load %arg19[%c0_139, %c0_140] : memref<32x16xbf16, #tpu.memory_space<vmem>>, vector<32x16xbf16>
    %cst_141 = arith.constant dense<0.000000e+00> : vector<2x16xf32>
    %340 = tpu.matmul %338, %339, %cst_141 {dimension_numbers = #tpu.dot_dimension_numbers<[1], [0], [0], [1], [0, 0, 1, 1], [], []>} : vector<2x32xbf16>, vector<32x16xbf16>, vector<2x16xf32> -> vector<2x16xf32>
    %c0_142 = arith.constant 0 : index
    %c0_143 = arith.constant 0 : index
    %341 = vector.load %arg20[%c0_142, %c0_143] : memref<1x16xf32, #tpu.memory_space<vmem>>, vector<1x16xf32>
    %342 = vector.broadcast %341 : vector<1x16xf32> to vector<2x16xf32>
    %343 = arith.addf %340, %342 : vector<2x16xf32>
    %cst_144 = arith.constant 0.000000e+00 : f32
    %344 = vector.broadcast %cst_144 : f32 to vector<2x16xf32>
    %345 = arith.maximumf %343, %344 : vector<2x16xf32>
    %346 = arith.truncf %345 : vector<2x16xf32> to vector<2x16xbf16>
    %c0_145 = arith.constant 0 : index
    %c0_146 = arith.constant 0 : index
    %347 = vector.load %arg21[%c0_145, %c0_146] : memref<16x16xbf16, #tpu.memory_space<vmem>>, vector<16x16xbf16>
    %cst_147 = arith.constant dense<0.000000e+00> : vector<2x16xf32>
    %348 = tpu.matmul %346, %347, %cst_147 {dimension_numbers = #tpu.dot_dimension_numbers<[1], [0], [0], [1], [0, 0, 1, 1], [], []>} : vector<2x16xbf16>, vector<16x16xbf16>, vector<2x16xf32> -> vector<2x16xf32>
    %c0_148 = arith.constant 0 : index
    %c0_149 = arith.constant 0 : index
    %349 = vector.load %arg22[%c0_148, %c0_149] : memref<1x16xf32, #tpu.memory_space<vmem>>, vector<1x16xf32>
    %350 = vector.broadcast %349 : vector<1x16xf32> to vector<2x16xf32>
    %351 = arith.addf %348, %350 : vector<2x16xf32>
    %cst_150 = arith.constant 0.000000e+00 : f32
    %352 = vector.broadcast %cst_150 : f32 to vector<2x16xf32>
    %353 = arith.maximumf %351, %352 : vector<2x16xf32>
    %354 = arith.mulf %353, %353 : vector<2x16xf32>
    %cst_151 = arith.constant dense<0.000000e+00> : vector<2xf32>
    %355 = vector.multi_reduction <add>, %354, %cst_151 [1] : vector<2x16xf32> to vector<2xf32>
    %356 = vector.shape_cast %355 : vector<2xf32> to vector<2x1xf32>
    %357 = math.sqrt %356 : vector<2x1xf32>
    %cst_152 = arith.constant 9.99999996E-13 : f32
    %358 = vector.broadcast %cst_152 : f32 to vector<2x1xf32>
    %359 = arith.maximumf %357, %358 : vector<2x1xf32>
    %360 = vector.broadcast %359 : vector<2x1xf32> to vector<2x16xf32>
    %361 = arith.divf %353, %360 : vector<2x16xf32>
    %c0_153 = arith.constant 0 : index
    %c0_154 = arith.constant 0 : index
    %362 = vector.load %arg23[%c0_153, %c0_154] : memref<2x16xf32, #tpu.memory_space<vmem>>, vector<2x16xf32>
    tpu.vector_store %arg23[%c0_153, %c0_154], %361 {strides = array<i32>} : memref<2x16xf32, #tpu.memory_space<vmem>>, vector<2x16xf32>,
    return
  }
}

</mosaic_0001>

<bundles_post_ra>
// kernel: bert_encoder_forward.1
= control target key start
LH: loop header
LB: loop body
LE: loop exit
PB: predicated region body
PF: predicated region fallthrough
CT: control target
= control target key end

     0   :  { %s3160_s0 = inlined_call_operand.vmem [shape: s32[16,1], index: 0, kind: input, shape index: {}]   ;;  %s3161_s1 = inlined_call_operand.vmem [shape: s32[16,1], index: 1, kind: input, shape index: {}]   ;;  %s3162_s2 = inlined_call_operand.vmem [shape: f32[2,8], index: 2, kind: input, shape index: {}]   ;;  %s3163_s3 = inlined_call_operand.vmem [shape: bf16[52,32], index: 3, kind: input, shape index: {}]   ;;  %s3164_s4 = inlined_call_operand.vmem [shape: f32[8,32], index: 4, kind: input, shape index: {}]   ;;  %s3165_s5 = inlined_call_operand.vmem [shape: f32[1,32], index: 5, kind: input, shape index: {}]   ;;  %s3166_s6 = inlined_call_operand.vmem [shape: f32[1,32], index: 6, kind: input, shape index: {}]   ;;  %s3167_s7 = inlined_call_operand.vmem [shape: bf16[2,32,96], index: 7, kind: input, shape index: {}]   ;;  %s3168_s8 = inlined_call_operand.vmem [shape: f32[2,1,96], index: 8, kind: input, shape index: {}]   ;;  %s3169_s9 = inlined_call_operand.vmem [shape: bf16[2,32,32], index: 9, kind: input, shape index: {}]   ;;  %s3170_s10 = inlined_call_operand.vmem [shape: f32[2,1,32], index: 10, kind: input, shape index: {}]   ;;  %s3171_s11 = inlined_call_operand.vmem [shape: f32[2,1,32], index: 11, kind: input, shape index: {}]   ;;  %s3172_s12 = inlined_call_operand.vmem [shape: f32[2,1,32], index: 12, kind: input, shape index: {}]   ;;  %s3173_s13 = inlined_call_operand.vmem [shape: bf16[2,32,64], index: 13, kind: input, shape index: {}]   ;;  %s3174_s14 = inlined_call_operand.vmem [shape: f32[2,1,64], index: 14, kind: input, shape index: {}]   ;;  %s3175_s15 = inlined_call_operand.vmem [shape: bf16[2,64,32], index: 15, kind: input, shape index: {}]   ;;  %s3176_s16 = inlined_call_operand.vmem [shape: f32[2,1,32], index: 16, kind: input, shape index: {}]   ;;  %s3177_s17 = inlined_call_operand.vmem [shape: f32[2,1,32], index: 17, kind: input, shape index: {}]   ;;  %s3178_s18 = inlined_call_operand.vmem [shape: f32[2,1,32], index: 18, kind: input, shape index: {}]   ;;  %s3179_s19 = inlined_call_operand.vmem [shape: bf16[32,16], index: 19, kind: input, shape index: {}]   ;;  %s3180_s20 = inlined_call_operand.vmem [shape: f32[1,16], index: 20, kind: input, shape index: {}]   ;;  %s3181_s21 = inlined_call_operand.vmem [shape: bf16[16,16], index: 21, kind: input, shape index: {}]   ;;  %s3182_s22 = inlined_call_operand.vmem [shape: f32[1,16], index: 22, kind: input, shape index: {}]   ;;  %s3183_s23 = inlined_call_operand.hbm [shape: f32[2,16], index: 23, kind: output, shape index: {}]  }
   0x1   :  { %3195 = sst [smem:[#allocation5_spill]] %s3160_s0 }
   0x2   :  { %3196 = sst [smem:[#allocation6_spill]] %s3161_s1 }
   0x3   :  { %3197 = sst [smem:[#allocation7_spill]] %s3162_s2 }
   0x4   :  { %3198 = sst [smem:[#allocation8_spill]] %s3163_s3 }
   0x5   :  { %3199 = sst [smem:[#allocation9_spill]] %s3164_s4 }
   0x6   :  { %3200 = sst [smem:[#allocation10_spill]] %s3165_s5 }
   0x7   :  { %3201 = sst [smem:[#allocation11_spill]] %s3166_s6 }
   0x8   :  { %3202 = sst [smem:[#allocation12_spill]] %s3167_s7 }
   0x9   :  { %3203 = sst [smem:[#allocation13_spill]] %s3178_s18 }
   0xa   :  { %s3204_s24 = sld [smem:[#allocation5_spill]]  ;;  %v2483_v2 = vmov 0  }
   0xb   :  { %s3205_s18 = sld [smem:[#allocation6_spill]]  ;;  %2302 = vset.pattern.permute.xlu0 %v2483_v2  ;;  %2303 = vset.pattern.permute.xlu1 %v2483_v2 }
  0x10   :  { %v116_v0 = vld [vmem:[%s3204_s24] sm:$0xff]  ;;  %v117_v6 = vld [vmem:[%s3204_s24 + $0x8] sm:$0xff] }
  0x11   :  { %v118_v1 = vld [vmem:[%s3205_s18] sm:$0xff]  ;;  %v119_v4 = vld [vmem:[%s3205_s18 + $0x8] sm:$0xff]  ;;  %125 = vperm.xlu0 %2302, %v116_v0  }
  0x12   :  { %v120_v3 = vadd.s32 50, %v118_v1  ;;  %v121_v5 = vadd.s32 50, %v119_v4 }
  0x14   :  { %133 = vperm.xlu1 %2303, %v120_v3  }
  0x15   :  { %28 = vsyncpa [#allocation3], 0  ;;  %s3206_s28 = sld [smem:[#allocation8_spill]]  ;;  %vm86_vm0 = vcmask 1041408   ;;  %v122_v14 = vlaneseq  ;;  %v2484_v20 = vmov 0.0   ;;  %vm176_vm7 = vcmask 424960  }
  0x16   :  { %s3207_s5 = sld [smem:[#allocation9_spill]]  ;;  %vm199_vm8 = vcmask 261120   ;;  %v2485_v31 = vmov 32.0   ;;  %s2486_s24 = smov 120  }
  0x17   :  { %v123_v17 = vand.u32 127, %v122_v14  ;;  %2356 = vrcp.f32 %v2485_v31  ;;  %s3208_s2 = sld [smem:[#allocation12_spill]]  ;;  %s2487_s25 = smov 96  }
  0x18   :  { %s3209_s18 = sld [smem:[#allocation10_spill]]  ;;  %s2489_s1 = smov 104  }
  0x19   :  { %128 = vperm.xlu0 %2302, %v117_v6   ;;  %s3210_s0 = sld [smem:[#allocation11_spill]]  ;;  %s3193_s26 = smov 64  }
  0x1a   :  { %s3211_s7 = sld [smem:[#allocation7_spill]]  ;;  %s3192_s29 = smov 16  }
  0x1b   :  { %v153_v7 = vld [vmem:[%s3206_s28 + $0x18] sm:$0x3]  ;;  %v2264_v11 = vld [vmem:[%s3206_s28 + $0x10] sm:$0xff]  ;;  %v2263_v12 = vld [vmem:[%s3206_s28 + $0x8] sm:$0xff] }
  0x1c   :  { %136 = vperm.xlu1 %2303, %v121_v5   ;;  %v168_v8 = vunpack.c.l.b16 %v153_v7  ;;  %v2262_v13 = vld [vmem:[%s3206_s28] sm:$0xff]  ;;  %s3191_s28 = smov 8  }
  0x1d   :  { %v154_v24 = vld [vmem:[%s3207_s5] sm:$0xff]  ;;  %v2357_v32 = vpop.eup %2356  ;;  %v2266_v48 = vld [vmem:[%s3208_s2 + $0x8] sm:$0xff]  ;;  %s2488_s5 = smov 112  }
  0x1e   :  { %v172_v9 = vpack.c.b16 %v168_v8, %v168_v8  ;;  %v207_v33 = vmul.f32 32.0, %v2357_v32  ;;  %vm211_vm9 = vweird.f32 %v2357_v32  ;;  %291 = vmatpush.bf16.msra.mxu1 %v2266_v48  ;;  %v2265_v50 = vld [vmem:[%s3208_s2] sm:$0xff] }
  0x1f   :  { %v2336_v5 = vld [vmem:[%s3209_s18] ss:$0 sm:$0xff]  ;;  %s3190_s18 = smov 24  }
  0x20   :  { %v181_v10 = vsel %vm86_vm0, %v172_v9, 0  ;;  %v208_v34 = vsub.f32 1.0, %v207_v33 }
  0x21   :  { %187 = vmatpush.bf16.msra.mxu0 %v181_v10  ;;  %v2337_v10 = vld [vmem:[%s3210_s0] ss:$0 sm:$0xff]  ;;  %s3212_s0 = sld [smem:[#allocation13_spill]] }
  0x22   :  { %v209_v35 = vmul.f32 %v2357_v32, %v208_v34  ;;  %292 = vmatpush.bf16.msra.mxu1 %v2265_v50 }
  0x24   :  { %v210_v36 = vadd.f32 %v2357_v32, %v209_v35 }
  0x25   :  { %188 = vmatpush.bf16.msra.mxu0 %v2264_v11 }
  0x26   :  { %v2646_v37 = vsel %vm211_vm9, %v2357_v32, %v210_v36 }
  0x29   :  { %189 = vmatpush.bf16.msra.mxu0 %v2263_v12 }
  0x2d   :  { %190 = vmatpush.bf16.msra.mxu0 %v2262_v13 }
  0x83   :  { %v126_v15 = vpop.permute.xlu0 %125 }
  0x84   :  { %vm130_vm1 = vcmp.eq.s32.totalorder %v123_v17, %v126_v15 }
  0x86   :  { %v134_v16 = vpop.permute.xlu1 %133 }
  0x87   :  { %vm138_vm2 = vcmp.eq.s32.totalorder %v123_v17, %v134_v16  ;;  %v2338_v16 = vld [vmem:[%s3168_s8] ss:$0 sm:$0xff] }
  0x88   :  { %vm140_vm3 = vmor %vm130_vm1, %vm138_vm2  ;;  %vm319_vm1 = vcmask 64512   ;;  %vm88_vm2 = vcmask 1043456  }
  0x89   :  { %v2085_v21 = vsel %vm140_vm3, 1.0, %v2484_v20  ;;  %vm90_vm3 = vcmask 1045504  }
  0x8b   :  { %v129_v18 = vpop.permute.xlu0 %128 }
  0x8c   :  { %vm131_vm4 = vcmp.eq.s32.totalorder %v123_v17, %v129_v18 }
  0x8e   :  { %v137_v19 = vpop.permute.xlu1 %136 }
  0x8f   :  { %vm139_vm5 = vcmp.eq.s32.totalorder %v123_v17, %v137_v19 }
  0x90   :  { %vm141_vm6 = vmor %vm131_vm4, %vm139_vm5  ;;  %vm809_vm4 = vcmask 195584  }
  0x91   :  { %v2086_v22 = vsel %vm141_vm6, 1.0, %v2484_v20 }
  0x92   :  { %v146_v23 = vpack.c.bf16 %v2086_v22, %v2085_v21 }
  0x94   :  { %2099 = vmatmul.msk.bf16.vlgmr.msra.gmra.mxu0 %vm176_vm7, %v146_v23 }
 0x111   :  { %v192_v25 = vpop.f32.mrf.mxu0 }
 0x112   :  { %v193_v26 = vadd.f32 %v192_v25, %v154_v24 }
 0x114   :  { %v200_v27 = vsel %vm199_vm8, %v193_v26, 0.0 }
 0x115   :  { %201 = vadd.xlane.f32.xlu2 %v200_v27 }
 0x119   :  { %v194_v28 = vpop.f32.mrf.mxu0 }
 0x11a   :  { %v195_v29 = vadd.f32 %v194_v28, %v154_v24 }
 0x11c   :  { %v203_v30 = vsel %vm199_vm8, %v195_v29, 0.0 }
 0x11d   :  { %204 = vadd.xlane.f32.xlu2 %v203_v30 }
 0x188   :  { %v202_v38 = vpop.xlane.xlu2 %201 }
 0x189   :  { %v213_v39 = vmul.f32 %v2646_v37, %v202_v38 }
 0x18b   :  { %v215_v40 = vsub.f32 %v193_v26, %v213_v39 }
 0x18d   :  { %v217_v41 = vmul.f32 %v215_v40, %v215_v40 }
 0x18f   :  { %v219_v42 = vsel %vm199_vm8, %v217_v41, 0.0 }
 0x190   :  { %220 = vadd.xlane.f32.xlu0 %v219_v42  ;;  %v205_v43 = vpop.xlane.xlu2 %204 }
 0x191   :  { %v214_v44 = vmul.f32 %v2646_v37, %v205_v43 }
 0x193   :  { %v216_v45 = vsub.f32 %v195_v29, %v214_v44 }
 0x195   :  { %v218_v46 = vmul.f32 %v216_v45, %v216_v45 }
 0x197   :  { %v222_v47 = vsel %vm199_vm8, %v218_v46, 0.0 }
 0x198   :  { %223 = vadd.xlane.f32.xlu1 %v222_v47 }
 0x203   :  { %v221_v49 = vpop.xlane.xlu0 %220 }
 0x204   :  { %v225_v51 = vmul.f32 %v221_v49, %v2646_v37 }
 0x206   :  { %v227_v52 = vadd.f32 1e-12, %v225_v51 }
 0x208   :  { %2358 = vrsqrt.f32 %v227_v52  ;;  %vm235_vm11 = vweird.f32 %v227_v52 }
 0x20b   :  { %v224_v53 = vpop.xlane.xlu1 %223 }
 0x20c   :  { %v226_v54 = vmul.f32 %v224_v53, %v2646_v37 }
 0x20e   :  { %v2359_v55 = vpop.eup %2358  ;;  %v228_v56 = vadd.f32 1e-12, %v226_v54 }
 0x20f   :  { %v230_v57 = vmul.f32 %v2359_v55, %v227_v52  ;;  %vm236_vm10 = vweird.f32 %v2359_v55 }
 0x210   :  { %2360 = vrsqrt.f32 %v228_v56  ;;  %vm237_vm12 = vmor %vm235_vm11, %vm236_vm10  ;;  %vm245_vm14 = vweird.f32 %v228_v56 }
 0x211   :  { %v231_v58 = vmul.f32 %v2359_v55, %v230_v57 }
 0x213   :  { %v232_v59 = vmul.f32 0.5, %v231_v58 }
 0x215   :  { %v233_v60 = vsub.f32 1.5, %v232_v59  ;;  %v76_v59 = vld [vmem:[%s3211_s7] sm:$0x3] }
 0x216   :  { %v2361_v61 = vpop.eup %2360 }
 0x217   :  { %v234_v62 = vmul.f32 %v2359_v55, %v233_v60  ;;  %v240_v63 = vmul.f32 %v2361_v61, %v228_v56  ;;  %vm246_vm13 = vweird.f32 %v2361_v61 }
 0x218   :  { %vm247_vm15 = vmor %vm245_vm14, %vm246_vm13 }
 0x219   :  { %v241_v0 = vmul.f32 %v2361_v61, %v240_v63  ;;  %v238_v1 = vsel %vm237_vm12, %v2359_v55, %v234_v62  ;;  %vm1001_vm12 = vcmask 523264  }
 0x21a   :  { %v249_v4 = vmul.f32 %v238_v1, %v215_v40 }
 0x21b   :  { %v242_v2 = vmul.f32 0.5, %v241_v0 }
 0x21c   :  { %v254_v9 = vmul.f32 %v2336_v5, %v249_v4 }
 0x21d   :  { %v243_v3 = vsub.f32 1.5, %v242_v2 }
 0x21e   :  { %v2666_v12 = vadd.f32 %v2337_v10, %v254_v9 }
 0x21f   :  { %v244_v6 = vmul.f32 %v2361_v61, %v243_v3 }
 0x221   :  { %v248_v7 = vsel %vm247_vm15, %v2361_v61, %v244_v6  ;;  %v77_v61 = vsub.f32 1.0, %v76_v59 }
 0x222   :  { %v250_v8 = vmul.f32 %v248_v7, %v216_v45 }
 0x223   :  { %v78_v62 = vmul.f32 -10000.0, %v77_v61 }
 0x224   :  { %v255_v11 = vmul.f32 %v2336_v5, %v250_v8 }
 0x225   :  { %v80_v3 = vrot.slane %v78_v62, 6  ;;  %v82_v4 = vrot.slane %v78_v62, 4  ;;  %v84_v6 = vrot.slane %v78_v62, 2 }
 0x226   :  { %v2668_v13 = vadd.f32 %v2337_v10, %v255_v11 }
 0x227   :  { %v87_v5 = vsel %vm86_vm0, %v78_v62, %v80_v3  ;;  %vm806_vm0 = vcmask 130048  }
 0x228   :  { %v261_v15 = vpack.c.bf16 %v2668_v13, %v2666_v12  ;;  %v89_v7 = vsel %vm88_vm2, %v87_v5, %v82_v4 }
 0x229   :  { %v2734_v8 = vsel %vm90_vm3, %v89_v7, %v84_v6 }
 0x22a   :  { %2108 = vmatmul.msk.bf16.vlgmr.msra.gmra.mxu1 %vm199_vm8, %v261_v15  ;;  %v100_v9 = vperm.slane %v2734_v8, 0  ;;  %v99_v4 = vrot.slane %v2734_v8, 7 }
 0x22c   :  { %v2780_v7 = vperm.slane %v99_v4, 0 }
 0x2a7   :  { %v294_v17 = vpop.f32.mrf.mxu1 }
 0x2a8   :  { %v295_v18 = vadd.f32 %v2338_v16, %v294_v17  ;;  %v93_v17 = vrot.slane %v2734_v8, 1 }
 0x2aa   :  { %v299_v19 = vpack.c.bf16 %v295_v18, %v295_v18 }
 0x2ac   :  { %303 = vrot.lane.b32.xlu2 %v299_v19, %s2486_s24  ;;  %v315_v20 = vunpack.c.l.b16 %v299_v19 }
 0x2ae   :  { %v316_v21 = vpack.c.b16 %v315_v20, %v315_v20 }
 0x2af   :  { %v296_v22 = vpop.f32.mrf.mxu1 }
 0x2b0   :  { %v297_v23 = vadd.f32 %v2338_v16, %v296_v22  ;;  %317 = vrot.lane.b32.xlu1 %v316_v21, %s2487_s25 }
 0x2b2   :  { %v300_v24 = vpack.c.bf16 %v297_v23, %v297_v23 }
 0x2b4   :  { %309 = vrot.lane.b32.xlu0 %v300_v24, %s2488_s5  ;;  %305 = vrot.lane.b32.xlu2 %v300_v24, %s2486_s24  ;;  %v339_v25 = vunpack.c.l.b16 %v300_v24 }
 0x2b6   :  { %v2683_v26 = vpack.c.b16 %v339_v25, %v339_v25  ;;  %v94_v25 = vrot.slane %v2734_v8, 2 }
 0x2bc   :  { %307 = vrot.lane.b32.xlu2 %v299_v19, %s2488_s5 }
 0x2c4   :  { %313 = vrot.lane.b32.xlu2 %v300_v24, %s2489_s1 }
 0x2cc   :  { %311 = vrot.lane.b32.xlu2 %v299_v19, %s2489_s1 }
 0x2d4   :  { %341 = vrot.lane.b32.xlu2 %v2683_v26, %s2487_s25 }
 0x306   :  { %v304_v27 = vpop.permute.xlu2 %303 }
 0x307   :  { %v362_v28 = vunpack.c.l.b16 %v304_v27 }
 0x309   :  { %v2687_v29 = vpack.c.b16 %v362_v28, %v362_v28 }
 0x30b   :  { %364 = vrot.lane.b32.xlu2 %v2687_v29, %s2487_s25 }
 0x30e   :  { %v306_v30 = vpop.permute.xlu2 %305 }
 0x30f   :  { %v385_v31 = vunpack.c.l.b16 %v306_v30 }
 0x311   :  { %v2691_v32 = vpack.c.b16 %v385_v31, %v385_v31 }
 0x313   :  { %387 = vrot.lane.b32.xlu0 %v2691_v32, %s2487_s25 }
 0x316   :  { %v308_v33 = vpop.permute.xlu2 %307 }
 0x317   :  { %v408_v34 = vunpack.c.l.b16 %v308_v33 }
 0x319   :  { %v2695_v35 = vpack.c.b16 %v408_v34, %v408_v34 }
 0x31b   :  { %410 = vrot.lane.b32.xlu1 %v2695_v35, %s2487_s25 }
 0x31e   :  { %v314_v36 = vpop.permute.xlu2 %313 }
 0x31f   :  { %v477_v38 = vunpack.c.l.b16 %v314_v36 }
 0x321   :  { %v2699_v39 = vpack.c.b16 %v477_v38, %v477_v38 }
 0x322   :  { %v318_v40 = vpop.permute.xlu1 %317 }
 0x323   :  { %479 = vrot.lane.b32.xlu0 %v2699_v39, %s2487_s25  ;;  %v324_v41 = vsel %vm319_vm1, %v318_v40, 0 }
 0x324   :  { %333 = vmatpush.bf16.xpose.msra.mxu2 %v324_v41 }
 0x326   :  { %v310_v42 = vpop.permute.xlu0 %309  ;;  %v312_v43 = vpop.permute.xlu2 %311 }
 0x327   :  { %v431_v44 = vunpack.c.l.b16 %v310_v42  ;;  %v454_v45 = vunpack.c.l.b16 %v312_v43 }
 0x329   :  { %v2704_v46 = vpack.c.b16 %v431_v44, %v431_v44  ;;  %v2706_v47 = vpack.c.b16 %v454_v45, %v454_v45 }
 0x32b   :  { %433 = vrot.lane.b32.xlu2 %v2704_v46, %s2487_s25  ;;  %612 = vrot.lane.b32.xlu0 %v316_v21, %s3193_s26 }
 0x32c   :  { %456 = vrot.lane.b32.xlu1 %v2706_v47, %s2487_s25  ;;  %2109 = vmatmul.msk.bf16.vlgmr.msra.gmra.mxu2 %vm319_vm1, %v299_v19  ;;  %v2741_v19 = vperm.slane %v93_v17, 0 }
 0x32e   :  { %v342_v48 = vpop.permute.xlu2 %341 }
 0x32f   :  { %v347_v49 = vsel %vm319_vm1, %v342_v48, 0  ;;  %v96_v48 = vrot.slane %v2734_v8, 4 }
 0x330   :  { %356 = vmatpush.bf16.xpose.msra.mxu3 %v347_v49 }
 0x331   :  { %v2762_v49 = vperm.slane %v96_v48, 0 }
 0x337   :  { %2110 = vmatmul.msk.bf16.vlgmr.msra.gmra.mxu3 %vm319_vm1, %v300_v24 }
 0x365   :  { %v365_v50 = vpop.permute.xlu2 %364 }
 0x366   :  { %v370_v51 = vsel %vm319_vm1, %v365_v50, 0 }
 0x367   :  { %379 = vmatpush.bf16.xpose.msrb.mxu1 %v370_v51 }
 0x36e   :  { %2111 = vmatmul.msk.bf16.vlgmr.msrb.gmra.mxu1 %vm319_vm1, %v304_v27  ;;  %v2746_v27 = vperm.slane %v94_v25, 0 }
 0x385   :  { %v388_v52 = vpop.permute.xlu0 %387  ;;  %v434_v53 = vpop.permute.xlu2 %433 }
 0x386   :  { %v393_v54 = vsel %vm319_vm1, %v388_v52, 0  ;;  %v439_v55 = vsel %vm319_vm1, %v434_v53, 0  ;;  %v95_v53 = vrot.slane %v2734_v8, 3 }
 0x387   :  { %402 = vmatpush.bf16.xpose.msrb.mxu2 %v393_v54  ;;  %448 = vmatpush.bf16.xpose.msrb.mxu0 %v439_v55 }
 0x38d   :  { %v411_v56 = vpop.permute.xlu1 %410 }
 0x38e   :  { %2112 = vmatmul.msk.bf16.vlgmr.msrb.gmra.mxu2 %vm319_vm1, %v306_v30  ;;  %2114 = vmatmul.msk.bf16.vlgmr.msrb.gmra.mxu0 %vm319_vm1, %v310_v42  ;;  %v416_v57 = vsel %vm319_vm1, %v411_v56, 0 }
 0x38f   :  { %425 = vmatpush.bf16.xpose.msrb.mxu3 %v416_v57  ;;  %v2767_v57 = vperm.slane %v95_v53, 0 }
 0x395   :  { %v480_v58 = vpop.permute.xlu0 %479 }
 0x396   :  { %v485_v60 = vsel %vm319_vm1, %v480_v58, 0  ;;  %2113 = vmatmul.msk.bf16.vlgmr.msrb.gmra.mxu3 %vm319_vm1, %v308_v33 }
 0x397   :  { %494 = vmatpush.bf16.xpose.msra.mxu2 %v485_v60 }
 0x39d   :  { %v613_v63 = vpop.permute.xlu0 %612 }
 0x39e   :  { %v618_v0 = vsel %vm88_vm2, %v613_v63, 0  ;;  %v457_v1 = vpop.permute.xlu1 %456  ;;  %2116 = vmatmul.msk.bf16.vlgmr.msra.gmra.mxu2 %vm319_vm1, %v314_v36  ;;  %v97_v36 = vrot.slane %v2734_v8, 5 }
 0x39f   :  { %v462_v2 = vsel %vm319_vm1, %v457_v1, 0  ;;  %627 = vmatpush.bf16.msra.mxu3 %v618_v0 }
 0x3a0   :  { %471 = vmatpush.bf16.xpose.msra.mxu1 %v462_v2  ;;  %v2754_v38 = vperm.slane %v97_v36, 0 }
 0x3a7   :  { %2115 = vmatmul.msk.bf16.vlgmr.msra.gmra.mxu1 %vm319_vm1, %v312_v43 }
 0x3af   :  { %v335_v10 = vpop.f32.mrf.mxu2 }
 0x3b0   :  { %v500_v11 = vmul.f32 0.35355338, %v335_v10 }
 0x3b2   :  { %v508_v15 = vadd.f32 %v500_v11, %v100_v9 }
 0x3b4   :  { %v516_v16 = vsel %vm319_vm1, %v508_v15, -inf }
 0x3b5   :  { %517 = vmax.xlane.f32.xlu0 %v516_v16 }
 0x3b7   :  { %v337_v18 = vpop.f32.mrf.mxu2 }
 0x3ba   :  { %v358_v20 = vpop.f32.mrf.mxu3 }
 0x3bb   :  { %v501_v21 = vmul.f32 0.35355338, %v358_v20 }
 0x3bd   :  { %v509_v22 = vadd.f32 %v501_v21, %v2741_v19 }
 0x3bf   :  { %v519_v23 = vsel %vm319_vm1, %v509_v22, -inf }
 0x3c0   :  { %520 = vmax.xlane.f32.xlu1 %v519_v23 }
 0x3c2   :  { %v360_v24 = vpop.f32.mrf.mxu3 }
 0x3eb   :  { %v381_v28 = vpop.f32.mrf.mxu1 }
 0x3ec   :  { %v502_v30 = vmul.f32 0.35355338, %v381_v28 }
 0x3ee   :  { %v2749_v31 = vadd.f32 %v502_v30, %v2746_v27 }
 0x3f0   :  { %v522_v33 = vsel %vm319_vm1, %v2749_v31, -inf }
 0x3f1   :  { %523 = vmax.xlane.f32.xlu0 %v522_v33 }
 0x3f3   :  { %v383_v34 = vpop.f32.mrf.mxu1 }
 0x40b   :  { %v450_v40 = vpop.f32.mrf.mxu0 }
 0x40c   :  { %v505_v41 = vmul.f32 0.35355338, %v450_v40 }
 0x40e   :  { %v2757_v42 = vadd.f32 %v505_v41, %v2754_v38 }
 0x410   :  { %v531_v43 = vsel %vm319_vm1, %v2757_v42, -inf }
 0x411   :  { %v404_v44 = vpop.f32.mrf.mxu2  ;;  %532 = vmax.xlane.f32.xlu0 %v531_v43 }
 0x412   :  { %v503_v55 = vmul.f32 0.35355338, %v404_v44 }
 0x413   :  { %v452_v45 = vpop.f32.mrf.mxu0 }
 0x414   :  { %v511_v60 = vadd.f32 %v503_v55, %v2767_v57 }
 0x416   :  { %v525_v62 = vsel %vm319_vm1, %v511_v60, -inf }
 0x419   :  { %v406_v50 = vpop.f32.mrf.mxu2  ;;  %v427_v51 = vpop.f32.mrf.mxu3 }
 0x41a   :  { %v504_v52 = vmul.f32 0.35355338, %v427_v51 }
 0x41c   :  { %v512_v54 = vadd.f32 %v504_v52, %v2762_v49 }
 0x41e   :  { %v528_v56 = vsel %vm319_vm1, %v512_v54, -inf }
 0x41f   :  { %529 = vmax.xlane.f32.xlu2 %v528_v56 }
 0x421   :  { %v429_v58 = vpop.f32.mrf.mxu3  ;;  %v496_v59 = vpop.f32.mrf.mxu2 }
 0x422   :  { %v507_v6 = vmul.f32 0.35355338, %v496_v59 }
 0x424   :  { %v473_v61 = vpop.f32.mrf.mxu1  ;;  %v2783_v10 = vadd.f32 %v507_v6, %v2780_v7 }
 0x425   :  { %654 = vrot.lane.b32.xlu0 %v2687_v29, %s3193_s26  ;;  %v506_v17 = vmul.f32 0.35355338, %v473_v61 }
 0x426   :  { %v537_v11 = vsel %vm319_vm1, %v2783_v10, -inf }
 0x427   :  { %526 = vmax.xlane.f32.xlu2 %v525_v62 }
 0x428   :  { %v518_v63 = vpop.xlane.xlu0 %517 }
 0x429   :  { %v540_v0 = vsub.f32 %v508_v15, %v518_v63  ;;  %v498_v1 = vpop.f32.mrf.mxu2  ;;  %v98_v15 = vrot.slane %v2734_v8, 6 }
 0x42b   :  { %v548_v2 = vmul.f32 1.442695, %v540_v0  ;;  %v2792_v18 = vperm.slane %v98_v15, 0 }
 0x42c   :  { %v475_v3 = vpop.f32.mrf.mxu1 }
 0x42d   :  { %2362 = vpow2.f32 %v548_v2  ;;  %696 = vrot.lane.b32.xlu0 %v2695_v35, %s3193_s26  ;;  %v2795_v21 = vadd.f32 %v506_v17, %v2792_v18 }
 0x42f   :  { %v534_v23 = vsel %vm319_vm1, %v2795_v21, -inf }
 0x433   :  { %v2776_v5 = vpop.eup %2362  ;;  %v521_v35 = vpop.xlane.xlu1 %520 }
 0x434   :  { %v564_v29 = vsel %vm319_vm1, %v2776_v5, 0.0  ;;  %v541_v16 = vsub.f32 %v509_v22, %v521_v35 }
 0x435   :  { %565 = vadd.xlane.f32.xlu1 %v564_v29 }
 0x436   :  { %v550_v20 = vmul.f32 1.442695, %v541_v16 }
 0x438   :  { %2364 = vpow2.f32 %v550_v20 }
 0x43d   :  { %538 = vmax.xlane.f32.xlu1 %v537_v11 }
 0x43e   :  { %v2799_v24 = vpop.eup %2364 }
 0x43f   :  { %675 = vrot.lane.b32.xlu2 %v2691_v32, %s3193_s26  ;;  %v567_v22 = vsel %vm319_vm1, %v2799_v24, 0.0 }
 0x456   :  { %633 = vrot.lane.b32.xlu1 %v2683_v26, %s3193_s26 }
 0x464   :  { %v524_v32 = vpop.xlane.xlu0 %523 }
 0x465   :  { %v542_v26 = vsub.f32 %v2749_v31, %v524_v32 }
 0x467   :  { %v552_v25 = vmul.f32 1.442695, %v542_v26 }
 0x468   :  { %535 = vmax.xlane.f32.xlu2 %v534_v23 }
 0x469   :  { %2366 = vpow2.f32 %v552_v25 }
 0x46f   :  { %v2804_v28 = vpop.eup %2366 }
 0x470   :  { %568 = vadd.xlane.f32.xlu2 %v567_v22  ;;  %v570_v30 = vsel %vm319_vm1, %v2804_v28, 0.0 }
 0x480   :  { %571 = vadd.xlane.f32.xlu1 %v570_v30 }
 0x484   :  { %v533_v33 = vpop.xlane.xlu0 %532 }
 0x485   :  { %v545_v34 = vsub.f32 %v2757_v42, %v533_v33 }
 0x487   :  { %v558_v36 = vmul.f32 1.442695, %v545_v34 }
 0x489   :  { %2368 = vpow2.f32 %v558_v36 }
 0x48f   :  { %v2809_v40 = vpop.eup %2368 }
 0x490   :  { %v579_v31 = vsel %vm319_vm1, %v2809_v40, 0.0 }
 0x491   :  { %580 = vadd.xlane.f32.xlu1 %v579_v31 }
 0x492   :  { %v530_v41 = vpop.xlane.xlu2 %529 }
 0x493   :  { %v544_v43 = vsub.f32 %v512_v54, %v530_v41 }
 0x495   :  { %v556_v44 = vmul.f32 1.442695, %v544_v43 }
 0x497   :  { %2370 = vpow2.f32 %v556_v44  ;;  %v655_v45 = vpop.permute.xlu0 %654 }
 0x498   :  { %v660_v48 = vsel %vm88_vm2, %v655_v45, 0 }
 0x499   :  { %669 = vmatpush.bf16.msrb.mxu1 %v660_v48 }
 0x49a   :  { %v527_v50 = vpop.xlane.xlu2 %526 }
 0x49b   :  { %v543_v51 = vsub.f32 %v511_v60, %v527_v50 }
 0x49d   :  { %v2371_v52 = vpop.eup %2370  ;;  %v554_v42 = vmul.f32 1.442695, %v543_v51 }
 0x49e   :  { %v576_v53 = vsel %vm319_vm1, %v2371_v52, 0.0 }
 0x49f   :  { %2372 = vpow2.f32 %v554_v42  ;;  %v697_v55 = vpop.permute.xlu0 %696  ;;  %577 = vadd.xlane.f32.xlu2 %v576_v53 }
 0x4a0   :  { %v702_v56 = vsel %vm88_vm2, %v697_v55, 0 }
 0x4a1   :  { %711 = vmatpush.bf16.msrb.mxu3 %v702_v56 }
 0x4a2   :  { %v676_v58 = vpop.permute.xlu2 %675 }
 0x4a3   :  { %v681_v54 = vsel %vm88_vm2, %v676_v58, 0 }
 0x4a4   :  { %690 = vmatpush.bf16.msrb.mxu2 %v681_v54 }
 0x4a5   :  { %v2373_v59 = vpop.eup %2372 }
 0x4a6   :  { %v573_v61 = vsel %vm319_vm1, %v2373_v59, 0.0 }
 0x4a7   :  { %574 = vadd.xlane.f32.xlu0 %v573_v61 }
 0x4a8   :  { %v566_v62 = vpop.xlane.xlu1 %565 }
 0x4a9   :  { %2374 = vrcp.f32 %v566_v62 }
 0x4aa   :  { %759 = vrot.lane.b32.xlu1 %v2699_v39, %s3193_s26 }
 0x4af   :  { %v2375_v60 = vpop.eup %2374 }
 0x4b0   :  { %v596_v63 = vmul.f32 %v2375_v60, %v2776_v5  ;;  %v539_v0 = vpop.xlane.xlu1 %538 }
 0x4b1   :  { %v547_v1 = vsub.f32 %v2783_v10, %v539_v0 }
 0x4b2   :  { %v604_v2 = vpack.c.bf16 %v596_v63, %v596_v63 }
 0x4b3   :  { %v562_v3 = vmul.f32 1.442695, %v547_v1 }
 0x4b4   :  { %2117 = vmatmul.msk.bf16.vlgmr.msra.gmra.mxu3 %vm319_vm1, %v604_v2 }
 0x4b5   :  { %2376 = vpow2.f32 %v562_v3 }
 0x4bb   :  { %v2377_v4 = vpop.eup %2376 }
 0x4bc   :  { %v585_v6 = vsel %vm319_vm1, %v2377_v4, 0.0 }
 0x4bd   :  { %586 = vadd.xlane.f32.xlu0 %v585_v6 }
 0x4c8   :  { %v634_v29 = vpop.permute.xlu1 %633 }
 0x4c9   :  { %v639_v11 = vsel %vm88_vm2, %v634_v29, 0 }
 0x4ca   :  { %648 = vmatpush.bf16.msra.mxu0 %v639_v11 }
 0x4d1   :  { %738 = vrot.lane.b32.xlu0 %v2706_v47, %s3193_s26 }
 0x4db   :  { %v536_v39 = vpop.xlane.xlu2 %535 }
 0x4dc   :  { %v546_v5 = vsub.f32 %v2795_v21, %v536_v39 }
 0x4de   :  { %v560_v10 = vmul.f32 1.442695, %v546_v5 }
 0x4e0   :  { %2378 = vpow2.f32 %v560_v10 }
 0x4e3   :  { %v569_v35 = vpop.xlane.xlu2 %568 }
 0x4e4   :  { %2380 = vrcp.f32 %v569_v35 }
 0x4e6   :  { %v2379_v15 = vpop.eup %2378 }
 0x4e7   :  { %v582_v16 = vsel %vm319_vm1, %v2379_v15, 0.0 }
 0x4e8   :  { %583 = vadd.xlane.f32.xlu2 %v582_v16 }
 0x4ea   :  { %v2381_v17 = vpop.eup %2380 }
 0x4eb   :  { %v597_v20 = vmul.f32 %v2381_v17, %v2799_v24 }
 0x4ed   :  { %v605_v23 = vpack.c.bf16 %v597_v20, %v597_v20  ;;  %v2268_v20 = vld [vmem:[%s3169_s9 + $0x8] sm:$0xff] }
 0x4ee   :  { %842 = vmatpush.bf16.msra.mxu3 %v2268_v20 }
 0x4ef   :  { %2118 = vmatmul.msk.bf16.vlgmr.msra.gmra.mxu0 %vm319_vm1, %v605_v23  ;;  %v2267_v23 = vld [vmem:[%s3169_s9] sm:$0xff] }
 0x4f2   :  { %843 = vmatpush.bf16.msra.mxu3 %v2267_v23 }
 0x4f3   :  { %v572_v32 = vpop.xlane.xlu1 %571 }
 0x4f4   :  { %2382 = vrcp.f32 %v572_v32 }
 0x4fa   :  { %v2383_v47 = vpop.eup %2382 }
 0x4fb   :  { %v598_v26 = vmul.f32 %v2383_v47, %v2804_v28 }
 0x4fd   :  { %v606_v21 = vpack.c.bf16 %v598_v26, %v598_v26 }
 0x4ff   :  { %2119 = vmatmul.msk.bf16.vlgmr.msrb.gmra.mxu1 %vm319_vm1, %v606_v21 }
 0x500   :  { %717 = vrot.lane.b32.xlu2 %v2704_v46, %s3193_s26 }
 0x504   :  { %v581_v25 = vpop.xlane.xlu1 %580 }
 0x512   :  { %v578_v22 = vpop.xlane.xlu2 %577 }
 0x513   :  { %2384 = vrcp.f32 %v578_v22 }
 0x519   :  { %v2385_v30 = vpop.eup %2384 }
 0x51a   :  { %v600_v33 = vmul.f32 %v2385_v30, %v2371_v52  ;;  %v575_v24 = vpop.xlane.xlu0 %574 }
 0x51b   :  { %2386 = vrcp.f32 %v575_v24 }
 0x51c   :  { %v608_v34 = vpack.c.bf16 %v600_v33, %v600_v33  ;;  %v760_v36 = vpop.permute.xlu1 %759 }
 0x51d   :  { %v765_v31 = vsel %vm88_vm2, %v760_v36, 0 }
 0x51e   :  { %2121 = vmatmul.msk.bf16.vlgmr.msrb.gmra.mxu3 %vm319_vm1, %v608_v34  ;;  %774 = vmatpush.bf16.msra.mxu2 %v765_v31 }
 0x521   :  { %v2387_v28 = vpop.eup %2386 }
 0x522   :  { %v599_v41 = vmul.f32 %v2387_v28, %v2373_v59 }
 0x524   :  { %v607_v43 = vpack.c.bf16 %v599_v41, %v599_v41 }
 0x526   :  { %2120 = vmatmul.msk.bf16.vlgmr.msrb.gmra.mxu2 %vm319_vm1, %v607_v43 }
 0x530   :  { %v587_v46 = vpop.xlane.xlu0 %586 }
 0x531   :  { %2388 = vrcp.f32 %v587_v46 }
 0x532   :  { %2390 = vrcp.f32 %v581_v25 }
 0x537   :  { %v2389_v44 = vpop.eup %2388  ;;  %v629_v45 = vpop.f32.mrf.mxu3 }
 0x538   :  { %v603_v48 = vmul.f32 %v2389_v44, %v2377_v4  ;;  %v2391_v55 = vpop.eup %2390  ;;  %v2339_v44 = vld [vmem:[%s3170_s10] ss:$0 sm:$0xff] }
 0x539   :  { %v601_v58 = vmul.f32 %v2391_v55, %v2809_v40 }
 0x53a   :  { %v611_v50 = vpack.c.bf16 %v603_v48, %v603_v48 }
 0x53b   :  { %v609_v60 = vpack.c.bf16 %v601_v58, %v601_v58 }
 0x53c   :  { %2124 = vmatmul.msk.bf16.vlgmr.msra.gmra.mxu2 %vm319_vm1, %v611_v50 }
 0x53f   :  { %v631_v51 = vpop.f32.mrf.mxu3 }
 0x543   :  { %v739_v52 = vpop.permute.xlu0 %738 }
 0x544   :  { %v744_v42 = vsel %vm88_vm2, %v739_v52, 0 }
 0x545   :  { %753 = vmatpush.bf16.msra.mxu1 %v744_v42 }
 0x55b   :  { %v584_v53 = vpop.xlane.xlu2 %583 }
 0x55c   :  { %2392 = vrcp.f32 %v584_v53 }
 0x562   :  { %v2393_v56 = vpop.eup %2392 }
 0x563   :  { %v602_v54 = vmul.f32 %v2393_v56, %v2379_v15  ;;  %v718_v59 = vpop.permute.xlu2 %717 }
 0x564   :  { %v723_v61 = vsel %vm88_vm2, %v718_v59, 0 }
 0x565   :  { %v610_v62 = vpack.c.bf16 %v602_v54, %v602_v54  ;;  %732 = vmatpush.bf16.msrb.mxu0 %v723_v61 }
 0x567   :  { %2123 = vmatmul.msk.bf16.vlgmr.msra.gmra.mxu1 %vm319_vm1, %v610_v62 }
 0x568   :  { %2122 = vmatmul.msk.bf16.vlgmr.msrb.gmra.mxu0 %vm319_vm1, %v609_v60 }
 0x56c   :  { %v650_v63 = vpop.f32.mrf.mxu0 }
 0x574   :  { %v652_v0 = vpop.f32.mrf.mxu0 }
 0x57c   :  { %v671_v1 = vpop.f32.mrf.mxu1 }
 0x584   :  { %v673_v2 = vpop.f32.mrf.mxu1 }
 0x5a1   :  { %v713_v3 = vpop.f32.mrf.mxu3 }
 0x5a9   :  { %v692_v4 = vpop.f32.mrf.mxu2  ;;  %v715_v6 = vpop.f32.mrf.mxu3 }
 0x5aa   :  { %v2304_v29 = vpack.i.bf16 %v692_v4, %v671_v1  ;;  %v2269_v4 = vld [vmem:[%s3173_s13] sm:$0xff] }
 0x5ac   :  { %2305 = vrot.lane.b32.xlu1 %v2304_v29, %s3191_s28 }
 0x5b1   :  { %v694_v40 = vpop.f32.mrf.mxu2 }
 0x5bf   :  { %v776_v11 = vpop.f32.mrf.mxu2 }
 0x5c7   :  { %v778_v39 = vpop.f32.mrf.mxu2 }
 0x5e4   :  { %v755_v5 = vpop.f32.mrf.mxu1 }
 0x5e5   :  { %v2314_v10 = vpack.i.bf16 %v776_v11, %v755_v5  ;;  %v734_v35 = vpop.f32.mrf.mxu0 }
 0x5e6   :  { %v2309_v15 = vpack.i.bf16 %v734_v35, %v713_v3 }
 0x5e7   :  { %2315 = vrot.lane.b32.xlu2 %v2314_v10, %s3190_s18 }
 0x5e8   :  { %2310 = vrot.lane.b32.xlu0 %v2309_v15, %s3192_s29 }
 0x5ec   :  { %v757_v16 = vpop.f32.mrf.mxu1 }
 0x5ed   :  { %v736_v17 = vpop.f32.mrf.mxu0 }
 0x61e   :  { %v2306_v32 = vpop.permute.xlu1 %2305 }
 0x61f   :  { %v2308_v47 = vunpack.i.h.bf16 %v2306_v32  ;;  %v2307_v26 = vunpack.i.l.bf16 %v2306_v32 }
 0x621   :  { %v805_v33 = vsel %vm319_vm1, %v650_v63, %v2308_v47  ;;  %v804_v24 = vsel %vm319_vm1, %v629_v45, %v2307_v26  ;;  %v2340_v26 = vld [vmem:[%s3171_s11] ss:$0 sm:$0xff] }
 0x641   :  { %v2316_v21 = vpop.permute.xlu2 %2315 }
 0x642   :  { %v2318_v34 = vunpack.i.h.bf16 %v2316_v21  ;;  %v2317_v36 = vunpack.i.l.bf16 %v2316_v21 }
 0x65a   :  { %v2311_v22 = vpop.permute.xlu0 %2310 }
 0x65b   :  { %v2313_v25 = vunpack.i.h.bf16 %v2311_v22  ;;  %v2312_v30 = vunpack.i.l.bf16 %v2311_v22 }
 0x65d   :  { %v807_v31 = vsel %vm806_vm0, %v804_v24, %v2312_v30  ;;  %v808_v28 = vsel %vm806_vm0, %v805_v33, %v2313_v25  ;;  %v2341_v30 = vld [vmem:[%s3172_s12] ss:$0 sm:$0xff] }
 0x65e   :  { %v810_v41 = vsel %vm809_vm4, %v807_v31, %v2317_v36  ;;  %v811_v43 = vsel %vm809_vm4, %v808_v28, %v2318_v34 }
 0x65f   :  { %v812_v46 = vpack.c.bf16 %v811_v43, %v810_v41  ;;  %v2274_v41 = vld [vmem:[%s3175_s15 + $0x18] sm:$0xff]  ;;  %v2273_v43 = vld [vmem:[%s3175_s15 + $0x10] sm:$0xff] }
 0x660   :  { %1009 = vmatpush.bf16.msrb.mxu1 %v2274_v41 }
 0x661   :  { %2133 = vmatmul.msk.bf16.vlgmr.msra.gmra.mxu3 %vm199_vm8, %v812_v46  ;;  %v2272_v46 = vld [vmem:[%s3175_s15 + $0x8] sm:$0xff] }
 0x664   :  { %1010 = vmatpush.bf16.msrb.mxu1 %v2273_v43 }
 0x668   :  { %1011 = vmatpush.bf16.msrb.mxu1 %v2272_v46 }
 0x6e4   :  { %v845_v48 = vpop.f32.mrf.mxu3 }
 0x6e5   :  { %v846_v50 = vadd.f32 %v2339_v44, %v845_v48  ;;  %v2342_v48 = vld [vmem:[%s3174_s14] ss:$0 sm:$0xff] }
 0x6e7   :  { %v850_v45 = vadd.f32 %v846_v50, %v2666_v12 }
 0x6e9   :  { %v854_v51 = vsel %vm199_vm8, %v850_v45, 0.0 }
 0x6ea   :  { %855 = vadd.xlane.f32.xlu1 %v854_v51 }
 0x6ec   :  { %v847_v52 = vpop.f32.mrf.mxu3 }
 0x6ed   :  { %v848_v42 = vadd.f32 %v2339_v44, %v847_v52  ;;  %v2271_v44 = vld [vmem:[%s3175_s15] sm:$0xff] }
 0x6ee   :  { %1012 = vmatpush.bf16.msrb.mxu1 %v2271_v44 }
 0x6ef   :  { %v851_v53 = vadd.f32 %v848_v42, %v2668_v13  ;;  %v2270_v13 = vld [vmem:[%s3173_s13 + $0x8] sm:$0xff] }
 0x6f0   :  { %938 = vmatpush.bf16.msra.mxu0 %v2270_v13 }
 0x6f1   :  { %v857_v55 = vsel %vm199_vm8, %v851_v53, 0.0 }
 0x6f2   :  { %858 = vadd.xlane.f32.xlu0 %v857_v55 }
 0x6f4   :  { %939 = vmatpush.bf16.msra.mxu0 %v2269_v4 }
 0x75d   :  { %v856_v56 = vpop.xlane.xlu1 %855 }
 0x75e   :  { %v860_v58 = vmul.f32 %v856_v56, %v2646_v37 }
 0x760   :  { %v862_v54 = vsub.f32 %v850_v45, %v860_v58 }
 0x762   :  { %v864_v59 = vmul.f32 %v862_v54, %v862_v54 }
 0x764   :  { %v866_v61 = vsel %vm199_vm8, %v864_v59, 0.0 }
 0x765   :  { %v859_v62 = vpop.xlane.xlu0 %858  ;;  %867 = vadd.xlane.f32.xlu2 %v866_v61 }
 0x766   :  { %v861_v12 = vmul.f32 %v859_v62, %v2646_v37 }
 0x768   :  { %v863_v60 = vsub.f32 %v851_v53, %v861_v12 }
 0x76a   :  { %v865_v63 = vmul.f32 %v863_v60, %v863_v60 }
 0x76c   :  { %v869_v0 = vsel %vm199_vm8, %v865_v63, 0.0 }
 0x76d   :  { %870 = vadd.xlane.f32.xlu1 %v869_v0 }
 0x7d8   :  { %v868_v1 = vpop.xlane.xlu2 %867 }
 0x7d9   :  { %v872_v2 = vmul.f32 %v868_v1, %v2646_v37 }
 0x7db   :  { %v874_v3 = vadd.f32 1e-12, %v872_v2 }
 0x7dd   :  { %2394 = vrsqrt.f32 %v874_v3  ;;  %vm882_vm6 = vweird.f32 %v874_v3 }
 0x7e0   :  { %v871_v6 = vpop.xlane.xlu1 %870 }
 0x7e1   :  { %v873_v29 = vmul.f32 %v871_v6, %v2646_v37 }
 0x7e3   :  { %v2395_v40 = vpop.eup %2394  ;;  %v875_v11 = vadd.f32 1e-12, %v873_v29  ;;  %v2343_v29 = vld [vmem:[%s3176_s16] ss:$0 sm:$0xff] }
 0x7e4   :  { %v877_v39 = vmul.f32 %v2395_v40, %v874_v3  ;;  %vm883_vm5 = vweird.f32 %v2395_v40 }
 0x7e5   :  { %2396 = vrsqrt.f32 %v875_v11  ;;  %vm884_vm7 = vmor %vm882_vm6, %vm883_vm5  ;;  %vm892_vm10 = vweird.f32 %v875_v11 }
 0x7e6   :  { %v878_v5 = vmul.f32 %v2395_v40, %v877_v39 }
 0x7e8   :  { %v879_v10 = vmul.f32 0.5, %v878_v5 }
 0x7ea   :  { %v880_v35 = vsub.f32 1.5, %v879_v10 }
 0x7eb   :  { %v2397_v15 = vpop.eup %2396 }
 0x7ec   :  { %v881_v16 = vmul.f32 %v2395_v40, %v880_v35  ;;  %v887_v17 = vmul.f32 %v2397_v15, %v875_v11  ;;  %vm893_vm9 = vweird.f32 %v2397_v15 }
 0x7ed   :  { %vm894_vm11 = vmor %vm892_vm10, %vm893_vm9 }
 0x7ee   :  { %v888_v20 = vmul.f32 %v2397_v15, %v887_v17  ;;  %v885_v23 = vsel %vm884_vm7, %v2395_v40, %v881_v16 }
 0x7ef   :  { %v896_v21 = vmul.f32 %v885_v23, %v862_v54 }
 0x7f0   :  { %v889_v32 = vmul.f32 0.5, %v888_v20 }
 0x7f1   :  { %v901_v33 = vmul.f32 %v2340_v26, %v896_v21 }
 0x7f2   :  { %v890_v47 = vsub.f32 1.5, %v889_v32 }
 0x7f3   :  { %v906_v36 = vadd.f32 %v2341_v30, %v901_v33  ;;  %v2276_v33 = vld [vmem:[%s3208_s2 + $0x18] sm:$0xff] }
 0x7f4   :  { %v891_v22 = vmul.f32 %v2397_v15, %v890_v47  ;;  %1109 = vmatpush.bf16.msrb.mxu2 %v2276_v33 }
 0x7f6   :  { %v895_v25 = vsel %vm894_vm11, %v2397_v15, %v891_v22  ;;  %vm1931_vm11 = vcmask 58368  }
 0x7f7   :  { %v897_v24 = vmul.f32 %v895_v25, %v863_v60 }
 0x7f9   :  { %v902_v34 = vmul.f32 %v2340_v26, %v897_v24 }
 0x7fb   :  { %v907_v31 = vadd.f32 %v2341_v30, %v902_v34 }
 0x7fd   :  { %v908_v28 = vpack.c.bf16 %v907_v31, %v906_v36 }
 0x7ff   :  { %2142 = vmatmul.msk.bf16.vlgmr.msra.gmra.mxu0 %vm199_vm8, %v908_v28 }
 0x87c   :  { %v941_v50 = vpop.f32.mrf.mxu0 }
 0x87d   :  { %v942_v45 = vadd.f32 %v2342_v48, %v941_v50 }
 0x87f   :  { %v948_v51 = vmul.f32 0.044715, %v942_v45  ;;  %v946_v13 = vmul.f32 0.5, %v942_v45 }
 0x881   :  { %v950_v52 = vmul.f32 %v948_v51, %v942_v45 }
 0x883   :  { %v952_v42 = vmul.f32 %v950_v52, %v942_v45 }
 0x884   :  { %v943_v53 = vpop.f32.mrf.mxu0 }
 0x885   :  { %v954_v55 = vadd.f32 %v952_v42, %v942_v45  ;;  %v944_v56 = vadd.f32 %v2342_v48, %v943_v53 }
 0x887   :  { %v949_v58 = vmul.f32 0.044715, %v944_v56  ;;  %v956_v54 = vmul.f32 0.7978846, %v954_v55  ;;  %v947_v1 = vmul.f32 0.5, %v944_v56 }
 0x889   :  { %v951_v59 = vmul.f32 %v949_v58, %v944_v56  ;;  %2398 = vtanh.f32 %v956_v54  ;;  %v2344_v54 = vld [vmem:[%s3177_s17] ss:$0 sm:$0xff] }
 0x88b   :  { %v953_v61 = vmul.f32 %v951_v59, %v944_v56 }
 0x88d   :  { %v955_v62 = vadd.f32 %v953_v61, %v944_v56 }
 0x88f   :  { %v957_v12 = vmul.f32 0.7978846, %v955_v62  ;;  %v2399_v60 = vpop.eup %2398 }
 0x890   :  { %v960_v63 = vadd.f32 1.0, %v2399_v60 }
 0x891   :  { %2400 = vtanh.f32 %v957_v12  ;;  %v2345_v12 = vld [vmem:[%s3212_s0] ss:$0 sm:$0xff] }
 0x892   :  { %v962_v3 = vmul.f32 %v960_v63, %v946_v13 }
 0x897   :  { %v2401_v0 = vpop.eup %2400 }
 0x898   :  { %v961_v2 = vadd.f32 1.0, %v2401_v0 }
 0x89a   :  { %v963_v4 = vmul.f32 %v961_v2, %v947_v1 }
 0x89c   :  { %v964_v6 = vpack.c.bf16 %v963_v4, %v962_v3  ;;  %v2346_v3 = vld [vmem:[%s3168_s8 + $0x1] ss:$0 sm:$0xff]  ;;  %s3213_s8 = smov 64  }
 0x89e   :  { %2159 = vmatmul.msk.bf16.vlgmr.msrb.gmra.mxu1 %vm1001_vm12, %v964_v6 }
 0x91b   :  { %v1014_v40 = vpop.f32.mrf.mxu1 }
 0x91c   :  { %v1015_v11 = vadd.f32 %v2343_v29, %v1014_v40 }
 0x91e   :  { %v1019_v39 = vadd.f32 %v1015_v11, %v906_v36 }
 0x920   :  { %v1023_v5 = vsel %vm199_vm8, %v1019_v39, 0.0 }
 0x921   :  { %1024 = vadd.xlane.f32.xlu2 %v1023_v5 }
 0x923   :  { %v1016_v10 = vpop.f32.mrf.mxu1 }
 0x924   :  { %v1017_v35 = vadd.f32 %v2343_v29, %v1016_v10 }
 0x926   :  { %v1020_v15 = vadd.f32 %v1017_v35, %v907_v31  ;;  %v2275_v31 = vld [vmem:[%s3208_s2 + $0x10] sm:$0xff] }
 0x927   :  { %1110 = vmatpush.bf16.msrb.mxu2 %v2275_v31 }
 0x928   :  { %v1026_v16 = vsel %vm199_vm8, %v1020_v15, 0.0 }
 0x929   :  { %1027 = vadd.xlane.f32.xlu0 %v1026_v16 }
 0x994   :  { %v1025_v17 = vpop.xlane.xlu2 %1024 }
 0x995   :  { %v1029_v20 = vmul.f32 %v1025_v17, %v2646_v37 }
 0x997   :  { %v1031_v23 = vsub.f32 %v1019_v39, %v1029_v20 }
 0x999   :  { %v1033_v32 = vmul.f32 %v1031_v23, %v1031_v23 }
 0x99b   :  { %v1035_v47 = vsel %vm199_vm8, %v1033_v32, 0.0 }
 0x99c   :  { %v1028_v26 = vpop.xlane.xlu0 %1027  ;;  %1036 = vadd.xlane.f32.xlu1 %v1035_v47 }
 0x99d   :  { %v1030_v21 = vmul.f32 %v1028_v26, %v2646_v37 }
 0x99f   :  { %v1032_v22 = vsub.f32 %v1020_v15, %v1030_v21 }
 0x9a1   :  { %v1034_v25 = vmul.f32 %v1032_v22, %v1032_v22 }
 0x9a3   :  { %v1038_v30 = vsel %vm199_vm8, %v1034_v25, 0.0 }
 0x9a4   :  { %1039 = vadd.xlane.f32.xlu2 %v1038_v30 }
 0xa0f   :  { %v1037_v24 = vpop.xlane.xlu1 %1036 }
 0xa10   :  { %v1041_v34 = vmul.f32 %v1037_v24, %v2646_v37 }
 0xa12   :  { %v1043_v36 = vadd.f32 1e-12, %v1041_v34 }
 0xa14   :  { %2402 = vrsqrt.f32 %v1043_v36  ;;  %vm1051_vm14 = vweird.f32 %v1043_v36 }
 0xa17   :  { %v1040_v28 = vpop.xlane.xlu2 %1039 }
 0xa18   :  { %v1042_v41 = vmul.f32 %v1040_v28, %v2646_v37 }
 0xa1a   :  { %v2403_v43 = vpop.eup %2402  ;;  %v1044_v46 = vadd.f32 1e-12, %v1042_v41 }
 0xa1b   :  { %v1046_v44 = vmul.f32 %v2403_v43, %v1043_v36  ;;  %vm1052_vm13 = vweird.f32 %v2403_v43 }
 0xa1c   :  { %2404 = vrsqrt.f32 %v1044_v46  ;;  %vm1053_vm15 = vmor %vm1051_vm14, %vm1052_vm13  ;;  %vm1061_vm5 = vweird.f32 %v1044_v46 }
 0xa1d   :  { %v1047_v48 = vmul.f32 %v2403_v43, %v1046_v44 }
 0xa1f   :  { %v1048_v50 = vmul.f32 0.5, %v1047_v48 }
 0xa21   :  { %v1049_v45 = vsub.f32 1.5, %v1048_v50 }
 0xa22   :  { %v2405_v51 = vpop.eup %2404 }
 0xa23   :  { %v1050_v52 = vmul.f32 %v2403_v43, %v1049_v45  ;;  %v1056_v42 = vmul.f32 %v2405_v51, %v1044_v46  ;;  %vm1062_vm3 = vweird.f32 %v2405_v51 }
 0xa24   :  { %vm1063_vm6 = vmor %vm1061_vm5, %vm1062_vm3 }
 0xa25   :  { %v1057_v53 = vmul.f32 %v2405_v51, %v1056_v42  ;;  %v1054_v55 = vsel %vm1053_vm15, %v2403_v43, %v1050_v52 }
 0xa26   :  { %v1065_v59 = vmul.f32 %v1054_v55, %v1031_v23 }
 0xa27   :  { %v1058_v56 = vmul.f32 0.5, %v1057_v53 }
 0xa28   :  { %v1070_v60 = vmul.f32 %v2344_v54, %v1065_v59 }
 0xa29   :  { %v1059_v58 = vsub.f32 1.5, %v1058_v56 }
 0xa2a   :  { %v2925_v13 = vadd.f32 %v2345_v12, %v1070_v60 }
 0xa2b   :  { %v1060_v61 = vmul.f32 %v2405_v51, %v1059_v58 }
 0xa2d   :  { %v1064_v62 = vsel %vm1063_vm6, %v2405_v51, %v1060_v61 }
 0xa2e   :  { %v1066_v63 = vmul.f32 %v1064_v62, %v1032_v22 }
 0xa30   :  { %v1071_v0 = vmul.f32 %v2344_v54, %v1066_v63 }
 0xa32   :  { %v2927_v1 = vadd.f32 %v2345_v12, %v1071_v0 }
 0xa34   :  { %v1077_v2 = vpack.c.bf16 %v2927_v1, %v2925_v13 }
 0xa36   :  { %2173 = vmatmul.msk.bf16.vlgmr.msrb.gmra.mxu2 %vm199_vm8, %v1077_v2 }
 0xab9   :  { %v1112_v4 = vpop.f32.mrf.mxu2 }
 0xaba   :  { %v1113_v6 = vadd.f32 %v2346_v3, %v1112_v4 }
 0xabc   :  { %v1117_v29 = vpack.c.bf16 %v1113_v6, %v1113_v6 }
 0xabe   :  { %1125 = vrot.lane.b32.xlu2 %v1117_v29, %s2488_s5  ;;  %1121 = vrot.lane.b32.xlu1 %v1117_v29, %s2486_s24  ;;  %v1133_v11 = vunpack.c.l.b16 %v1117_v29 }
 0xac0   :  { %v1134_v10 = vpack.c.b16 %v1133_v11, %v1133_v11 }
 0xac1   :  { %v1114_v40 = vpop.f32.mrf.mxu2 }
 0xac2   :  { %v1115_v39 = vadd.f32 %v2346_v3, %v1114_v40 }
 0xac4   :  { %v1118_v5 = vpack.c.bf16 %v1115_v39, %v1115_v39 }
 0xac6   :  { %1123 = vrot.lane.b32.xlu0 %v1118_v5, %s2486_s24  ;;  %1129 = vrot.lane.b32.xlu2 %v1117_v29, %s2489_s1  ;;  %v1156_v35 = vunpack.c.l.b16 %v1118_v5  ;;  %s3214_s24 = smov 16  }
 0xac7   :  { %1135 = vrot.lane.b32.xlu1 %v1134_v10, %s2487_s25 }
 0xac8   :  { %v1157_v15 = vpack.c.b16 %v1156_v35, %v1156_v35 }
 0xace   :  { %1131 = vrot.lane.b32.xlu0 %v1118_v5, %s2489_s1  ;;  %1158 = vrot.lane.b32.xlu2 %v1157_v15, %s2487_s25 }
 0xad6   :  { %1127 = vrot.lane.b32.xlu0 %v1118_v5, %s2488_s5  ;;  %s3216_s5 = smov 24  }
 0xb18   :  { %v1126_v16 = vpop.permute.xlu2 %1125 }
 0xb19   :  { %v1225_v24 = vunpack.c.l.b16 %v1126_v16 }
 0xb1b   :  { %v2954_v31 = vpack.c.b16 %v1225_v24, %v1225_v24 }
 0xb20   :  { %v2943_v17 = vpop.permute.xlu2 %1129 }
 0xb21   :  { %v1271_v41 = vunpack.c.l.b16 %v2943_v17 }
 0xb23   :  { %v2963_v44 = vpack.c.b16 %v1271_v41, %v1271_v41 }
 0xb28   :  { %v1159_v20 = vpop.permute.xlu2 %1158 }
 0xb29   :  { %v1164_v23 = vsel %vm319_vm1, %v1159_v20, 0 }
 0xb2a   :  { %1173 = vmatpush.bf16.xpose.msrb.mxu0 %v1164_v23 }
 0xb30   :  { %v1122_v32 = vpop.permute.xlu1 %1121 }
 0xb31   :  { %v1179_v47 = vunpack.c.l.b16 %v1122_v32  ;;  %2175 = vmatmul.msk.bf16.vlgmr.msrb.gmra.mxu0 %vm319_vm1, %v1118_v5 }
 0xb33   :  { %v2947_v26 = vpack.c.b16 %v1179_v47, %v1179_v47 }
 0xb35   :  { %1181 = vrot.lane.b32.xlu1 %v2947_v26, %s2487_s25 }
 0xb38   :  { %v1124_v21 = vpop.permute.xlu0 %1123 }
 0xb39   :  { %v1202_v22 = vunpack.c.l.b16 %v1124_v21  ;;  %v1136_v25 = vpop.permute.xlu1 %1135 }
 0xb3a   :  { %v1141_v30 = vsel %vm319_vm1, %v1136_v25, 0 }
 0xb3b   :  { %v1203_v33 = vpack.c.b16 %v1202_v22, %v1202_v22  ;;  %1150 = vmatpush.bf16.xpose.msrb.mxu3 %v1141_v30 }
 0xb3d   :  { %1204 = vrot.lane.b32.xlu0 %v1203_v33, %s2487_s25 }
 0xb40   :  { %v1132_v34 = vpop.permute.xlu0 %1131 }
 0xb41   :  { %v1294_v36 = vunpack.c.l.b16 %v1132_v34 }
 0xb42   :  { %2174 = vmatmul.msk.bf16.vlgmr.msrb.gmra.mxu3 %vm319_vm1, %v1117_v29 }
 0xb43   :  { %v2956_v28 = vpack.c.b16 %v1294_v36, %v1294_v36 }
 0xb45   :  { %1296 = vrot.lane.b32.xlu2 %v2956_v28, %s2487_s25  ;;  %1227 = vrot.lane.b32.xlu0 %v2954_v31, %s2487_s25 }
 0xb48   :  { %v1128_v43 = vpop.permute.xlu0 %1127 }
 0xb49   :  { %v1248_v46 = vunpack.c.l.b16 %v1128_v43 }
 0xb4b   :  { %v2965_v48 = vpack.c.b16 %v1248_v46, %v1248_v46 }
 0xb4d   :  { %1273 = vrot.lane.b32.xlu0 %v2963_v44, %s2487_s25  ;;  %1429 = vrot.lane.b32.xlu2 %v1134_v10, %s3213_s8 }
 0xb4e   :  { %1250 = vrot.lane.b32.xlu1 %v2965_v48, %s2487_s25  ;;  %s3215_s25 = smov 8  }
 0xb55   :  { %1450 = vrot.lane.b32.xlu0 %v1157_v15, %s3213_s8 }
 0xb56   :  { %1492 = vrot.lane.b32.xlu1 %v1203_v33, %s3213_s8 }
 0xb9f   :  { %v1297_v51 = vpop.permute.xlu2 %1296 }
 0xba0   :  { %v1302_v56 = vsel %vm319_vm1, %v1297_v51, 0 }
 0xba7   :  { %v1182_v50 = vpop.permute.xlu1 %1181  ;;  %v1430_v59 = vpop.permute.xlu2 %1429 }
 0xba8   :  { %v1187_v45 = vsel %vm319_vm1, %v1182_v50, 0  ;;  %v1435_v60 = vsel %vm88_vm2, %v1430_v59, 0 }
 0xba9   :  { %1196 = vmatpush.bf16.xpose.msra.mxu1 %v1187_v45 }
 0xbae   :  { %v1175_v52 = vpop.f32.mrf.mxu0 }
 0xbaf   :  { %v1318_v42 = vmul.f32 0.35355338, %v1175_v52  ;;  %v1205_v53 = vpop.permute.xlu0 %1204 }
 0xbb0   :  { %v1210_v55 = vsel %vm319_vm1, %v1205_v53, 0  ;;  %2176 = vmatmul.msk.bf16.vlgmr.msra.gmra.mxu1 %vm319_vm1, %v1122_v32 }
 0xbb1   :  { %1219 = vmatpush.bf16.xpose.msra.mxu2 %v1210_v55  ;;  %v2979_v58 = vadd.f32 %v1318_v42, %v2741_v19 }
 0xbb3   :  { %v1336_v54 = vsel %vm319_vm1, %v2979_v58, -inf }
 0xbb4   :  { %1337 = vmax.xlane.f32.xlu0 %v1336_v54 }
 0xbb6   :  { %v1177_v61 = vpop.f32.mrf.mxu0 }
 0xbb7   :  { %v1228_v62 = vpop.permute.xlu0 %1227 }
 0xbb8   :  { %v1233_v12 = vsel %vm319_vm1, %v1228_v62, 0  ;;  %2177 = vmatmul.msk.bf16.vlgmr.msra.gmra.mxu2 %vm319_vm1, %v1124_v21 }
 0xbb9   :  { %1311 = vmatpush.bf16.xpose.msrb.mxu2 %v1302_v56  ;;  %1242 = vmatpush.bf16.xpose.msra.mxu3 %v1233_v12 }
 0xbbf   :  { %v1274_v63 = vpop.permute.xlu0 %1273 }
 0xbc0   :  { %v1279_v19 = vsel %vm319_vm1, %v1274_v63, 0  ;;  %v1251_v0 = vpop.permute.xlu1 %1250  ;;  %2178 = vmatmul.msk.bf16.vlgmr.msra.gmra.mxu3 %vm319_vm1, %v1126_v16 }
 0xbc1   :  { %1444 = vmatpush.bf16.msrb.mxu3 %v1435_v60  ;;  %v1256_v2 = vsel %vm319_vm1, %v1251_v0, 0  ;;  %1288 = vmatpush.bf16.xpose.msrb.mxu1 %v1279_v19 }
 0xbc2   :  { %1265 = vmatpush.bf16.xpose.msra.mxu0 %v1256_v2 }
 0xbc5   :  { %v1152_v3 = vpop.f32.mrf.mxu3 }
 0xbc6   :  { %v1317_v4 = vmul.f32 0.35355338, %v1152_v3 }
 0xbc7   :  { %v1451_v6 = vpop.permute.xlu0 %1450 }
 0xbc8   :  { %v1456_v29 = vsel %vm88_vm2, %v1451_v6, 0  ;;  %v1493_v40 = vpop.permute.xlu1 %1492  ;;  %2180 = vmatmul.msk.bf16.vlgmr.msrb.gmra.mxu1 %vm319_vm1, %v2943_v17  ;;  %2181 = vmatmul.msk.bf16.vlgmr.msrb.gmra.mxu2 %vm319_vm1, %v1132_v34  ;;  %v1325_v11 = vadd.f32 %v1317_v4, %v100_v9 }
 0xbc9   :  { %v1498_v39 = vsel %vm88_vm2, %v1493_v40, 0  ;;  %2179 = vmatmul.msk.bf16.vlgmr.msra.gmra.mxu0 %vm319_vm1, %v1128_v43 }
 0xbca   :  { %1465 = vmatpush.bf16.msrb.mxu0 %v1456_v29  ;;  %1507 = vmatpush.bf16.msra.mxu2 %v1498_v39  ;;  %v1333_v5 = vsel %vm319_vm1, %v1325_v11, -inf }
 0xbcb   :  { %1334 = vmax.xlane.f32.xlu2 %v1333_v5 }
 0xbcd   :  { %v1154_v10 = vpop.f32.mrf.mxu3 }
 0xc27   :  { %v1338_v59 = vpop.xlane.xlu0 %1337 }
 0xc28   :  { %v1358_v61 = vsub.f32 %v2979_v58, %v1338_v59 }
 0xc2a   :  { %v1367_v62 = vmul.f32 1.442695, %v1358_v61 }
 0xc2d   :  { %v1198_v35 = vpop.f32.mrf.mxu1 }
 0xc2e   :  { %v1319_v15 = vmul.f32 0.35355338, %v1198_v35 }
 0xc30   :  { %v1327_v16 = vadd.f32 %v1319_v15, %v2746_v27 }
 0xc32   :  { %v1339_v17 = vsel %vm319_vm1, %v1327_v16, -inf }
 0xc33   :  { %1340 = vmax.xlane.f32.xlu2 %v1339_v17 }
 0xc35   :  { %v1200_v20 = vpop.f32.mrf.mxu1 }
 0xc3b   :  { %v1221_v8 = vpop.f32.mrf.mxu2 }
 0xc3c   :  { %v1320_v24 = vmul.f32 0.35355338, %v1221_v8 }
 0xc3e   :  { %v1335_v9 = vpop.xlane.xlu2 %1334  ;;  %v3006_v50 = vadd.f32 %v1320_v24, %v2767_v57 }
 0xc3f   :  { %v1357_v23 = vsub.f32 %v1325_v11, %v1335_v9 }
 0xc40   :  { %v1342_v42 = vsel %vm319_vm1, %v3006_v50, -inf }
 0xc41   :  { %v1365_v32 = vmul.f32 1.442695, %v1357_v23 }
 0xc43   :  { %2406 = vpow2.f32 %v1365_v32  ;;  %v1223_v47 = vpop.f32.mrf.mxu2  ;;  %v1244_v21 = vpop.f32.mrf.mxu3 }
 0xc44   :  { %v1321_v22 = vmul.f32 0.35355338, %v1244_v21  ;;  %2408 = vpow2.f32 %v1367_v62 }
 0xc45   :  { %v1290_v25 = vpop.f32.mrf.mxu1 }
 0xc46   :  { %v1267_v30 = vpop.f32.mrf.mxu0  ;;  %v1329_v33 = vadd.f32 %v1321_v22, %v2762_v49  ;;  %v1323_v52 = vmul.f32 0.35355338, %v1290_v25 }
 0xc47   :  { %v1322_v57 = vmul.f32 0.35355338, %v1267_v30 }
 0xc48   :  { %v1345_v34 = vsel %vm319_vm1, %v1329_v33, -inf  ;;  %v1331_v56 = vadd.f32 %v1323_v52, %v2792_v18 }
 0xc49   :  { %v2407_v27 = vpop.eup %2406  ;;  %1346 = vmax.xlane.f32.xlu1 %v1345_v34  ;;  %v1330_v54 = vadd.f32 %v1322_v57, %v2754_v38 }
 0xc4a   :  { %v1381_v36 = vsel %vm319_vm1, %v2407_v27, 0.0  ;;  %v3019_v12 = vpop.eup %2408 }
 0xc4b   :  { %1382 = vadd.xlane.f32.xlu0 %v1381_v36  ;;  %v1246_v41 = vpop.f32.mrf.mxu3  ;;  %v1313_v43 = vpop.f32.mrf.mxu2  ;;  %1471 = vrot.lane.b32.xlu2 %v2947_v26, %s3213_s8  ;;  %v1351_v26 = vsel %vm319_vm1, %v1331_v56, -inf  ;;  %v1384_v18 = vsel %vm319_vm1, %v3019_v12, 0.0 }
 0xc4c   :  { %v1324_v46 = vmul.f32 0.35355338, %v1313_v43 }
 0xc4d   :  { %v1292_v45 = vpop.f32.mrf.mxu1 }
 0xc4e   :  { %v1269_v51 = vpop.f32.mrf.mxu0  ;;  %v1332_v49 = vadd.f32 %v1324_v46, %v2780_v7  ;;  %v1348_v7 = vsel %vm319_vm1, %v1330_v54, -inf }
 0xc50   :  { %v1354_v53 = vsel %vm319_vm1, %v1332_v49, -inf }
 0xc51   :  { %1343 = vmax.xlane.f32.xlu1 %v1342_v42 }
 0xc53   :  { %1355 = vmax.xlane.f32.xlu0 %v1354_v53  ;;  %v1315_v55 = vpop.f32.mrf.mxu2 }
 0xc59   :  { %1352 = vmax.xlane.f32.xlu1 %v1351_v26 }
 0xc72   :  { %1513 = vrot.lane.b32.xlu1 %v2954_v31, %s3213_s8 }
 0xc74   :  { %1349 = vmax.xlane.f32.xlu2 %v1348_v7 }
 0xc9c   :  { %1385 = vadd.xlane.f32.xlu1 %v1384_v18 }
 0xca6   :  { %v1341_v60 = vpop.xlane.xlu2 %1340 }
 0xca7   :  { %v1359_v63 = vsub.f32 %v1327_v16, %v1341_v60 }
 0xca9   :  { %v1369_v38 = vmul.f32 1.442695, %v1359_v63 }
 0xcab   :  { %2410 = vpow2.f32 %v1369_v38 }
 0xcae   :  { %v1472_v19 = vpop.permute.xlu2 %1471 }
 0xcaf   :  { %v1477_v31 = vsel %vm88_vm2, %v1472_v19, 0 }
 0xcb0   :  { %1486 = vmatpush.bf16.msra.mxu1 %v1477_v31 }
 0xcb1   :  { %v2411_v0 = vpop.eup %2410 }
 0xcb2   :  { %v1387_v2 = vsel %vm319_vm1, %v2411_v0, 0.0 }
 0xcb3   :  { %1388 = vadd.xlane.f32.xlu0 %v1387_v2 }
 0xcbc   :  { %v1347_v58 = vpop.xlane.xlu1 %1346 }
 0xcbd   :  { %v1361_v3 = vsub.f32 %v1329_v33, %v1347_v58 }
 0xcbe   :  { %v1383_v4 = vpop.xlane.xlu0 %1382 }
 0xcbf   :  { %v1373_v6 = vmul.f32 1.442695, %v1361_v3  ;;  %2412 = vrcp.f32 %v1383_v4 }
 0xcc1   :  { %2414 = vpow2.f32 %v1373_v6 }
 0xcc4   :  { %v1344_v29 = vpop.xlane.xlu1 %1343 }
 0xcc5   :  { %v2413_v40 = vpop.eup %2412  ;;  %v1360_v33 = vsub.f32 %v3006_v50, %v1344_v29 }
 0xcc6   :  { %v1413_v11 = vmul.f32 %v2413_v40, %v2407_v27  ;;  %v1356_v39 = vpop.xlane.xlu0 %1355 }
 0xcc7   :  { %v2415_v5 = vpop.eup %2414  ;;  %v1364_v10 = vsub.f32 %v1332_v49, %v1356_v39  ;;  %v1371_v34 = vmul.f32 1.442695, %v1360_v33  ;;  %v2278_v33 = vld [vmem:[%s3169_s9 + $0x18] sm:$0xff] }
 0xcc8   :  { %v1421_v35 = vpack.c.bf16 %v1413_v11, %v1413_v11  ;;  %v1393_v15 = vsel %vm319_vm1, %v2415_v5, 0.0 }
 0xcc9   :  { %v1379_v16 = vmul.f32 1.442695, %v1364_v10  ;;  %1394 = vadd.xlane.f32.xlu0 %v1393_v15 }
 0xcca   :  { %2182 = vmatmul.msk.bf16.vlgmr.msrb.gmra.mxu3 %vm319_vm1, %v1421_v35 }
 0xccb   :  { %2416 = vpow2.f32 %v1379_v16 }
 0xccc   :  { %v1353_v17 = vpop.xlane.xlu1 %1352 }
 0xccd   :  { %v1363_v20 = vsub.f32 %v1331_v56, %v1353_v17 }
 0xccf   :  { %v1377_v8 = vmul.f32 1.442695, %v1363_v20 }
 0xcd1   :  { %v3027_v9 = vpop.eup %2416  ;;  %2418 = vpow2.f32 %v1377_v8 }
 0xcd2   :  { %v1402_v23 = vsel %vm319_vm1, %v3027_v9, 0.0 }
 0xcd3   :  { %1403 = vadd.xlane.f32.xlu1 %v1402_v23 }
 0xcd7   :  { %v2419_v32 = vpop.eup %2418 }
 0xcd8   :  { %v1399_v47 = vsel %vm319_vm1, %v2419_v32, 0.0 }
 0xcd9   :  { %1400 = vadd.xlane.f32.xlu0 %v1399_v47 }
 0xce4   :  { %v1514_v21 = vpop.permute.xlu1 %1513 }
 0xce5   :  { %v1519_v22 = vsel %vm88_vm2, %v1514_v21, 0 }
 0xce6   :  { %1528 = vmatpush.bf16.msra.mxu3 %v1519_v22 }
 0xce7   :  { %v1350_v25 = vpop.xlane.xlu2 %1349 }
 0xce8   :  { %v1362_v30 = vsub.f32 %v1330_v54, %v1350_v25 }
 0xcea   :  { %v1375_v24 = vmul.f32 1.442695, %v1362_v30  ;;  %1659 = vmatpush.bf16.msrb.mxu3 %v2278_v33 }
 0xcec   :  { %2420 = vpow2.f32 %v1375_v24  ;;  %1555 = vrot.lane.b32.xlu1 %v2963_v44, %s3213_s8  ;;  %v2277_v24 = vld [vmem:[%s3169_s9 + $0x10] sm:$0xff] }
 0xced   :  { %1534 = vrot.lane.b32.xlu0 %v2965_v48, %s3213_s8  ;;  %2422 = vpow2.f32 %v1371_v34 }
 0xcee   :  { %1660 = vmatpush.bf16.msrb.mxu3 %v2277_v24 }
 0xcf2   :  { %v2421_v27 = vpop.eup %2420 }
 0xcf3   :  { %v1396_v36 = vsel %vm319_vm1, %v2421_v27, 0.0  ;;  %v2423_v41 = vpop.eup %2422 }
 0xcf4   :  { %1397 = vadd.xlane.f32.xlu2 %v1396_v36  ;;  %v1390_v43 = vsel %vm319_vm1, %v2423_v41, 0.0 }
 0xcfc   :  { %1391 = vadd.xlane.f32.xlu2 %v1390_v43 }
 0xd0f   :  { %v1386_v46 = vpop.xlane.xlu1 %1385 }
 0xd10   :  { %2424 = vrcp.f32 %v1386_v46 }
 0xd14   :  { %1576 = vrot.lane.b32.xlu2 %v2956_v28, %s3213_s8 }
 0xd16   :  { %v2425_v50 = vpop.eup %2424 }
 0xd17   :  { %v1414_v44 = vmul.f32 %v2425_v50, %v3019_v12 }
 0xd19   :  { %v1422_v45 = vpack.c.bf16 %v1414_v44, %v1414_v44 }
 0xd1b   :  { %2183 = vmatmul.msk.bf16.vlgmr.msrb.gmra.mxu0 %vm319_vm1, %v1422_v45 }
 0xd26   :  { %v1389_v48 = vpop.xlane.xlu0 %1388 }
 0xd27   :  { %2426 = vrcp.f32 %v1389_v48 }
 0xd2d   :  { %v2427_v51 = vpop.eup %2426 }
 0xd2e   :  { %v1415_v49 = vmul.f32 %v2427_v51, %v2411_v0 }
 0xd30   :  { %v1423_v52 = vpack.c.bf16 %v1415_v49, %v1415_v49 }
 0xd32   :  { %2184 = vmatmul.msk.bf16.vlgmr.msra.gmra.mxu1 %vm319_vm1, %v1423_v52 }
 0xd3c   :  { %v1395_v42 = vpop.xlane.xlu0 %1394 }
 0xd3d   :  { %2428 = vrcp.f32 %v1395_v42 }
 0xd43   :  { %v2429_v53 = vpop.eup %2428 }
 0xd44   :  { %v1417_v55 = vmul.f32 %v2429_v53, %v2415_v5 }
 0xd46   :  { %v1425_v56 = vpack.c.bf16 %v1417_v55, %v1417_v55  ;;  %v1404_v54 = vpop.xlane.xlu1 %1403 }
 0xd48   :  { %2186 = vmatmul.msk.bf16.vlgmr.msra.gmra.mxu3 %vm319_vm1, %v1425_v56  ;;  %v2347_v56 = vld [vmem:[%s3170_s10 + $0x1] ss:$0 sm:$0xff] }
 0xd4c   :  { %v1401_v26 = vpop.xlane.xlu0 %1400 }
 0xd4d   :  { %v3046_v28 = vpop.f32.mrf.mxu3  ;;  %2430 = vrcp.f32 %v1401_v26 }
 0xd53   :  { %v2431_v7 = vpop.eup %2430 }
 0xd54   :  { %v1419_v59 = vmul.f32 %v2431_v7, %v2419_v32 }
 0xd55   :  { %v1448_v57 = vpop.f32.mrf.mxu3 }
 0xd56   :  { %v1427_v60 = vpack.c.bf16 %v1419_v59, %v1419_v59 }
 0xd5e   :  { %v1556_v61 = vpop.permute.xlu1 %1555 }
 0xd5f   :  { %v1561_v62 = vsel %vm88_vm2, %v1556_v61, 0  ;;  %v1535_v12 = vpop.permute.xlu0 %1534 }
 0xd60   :  { %v1540_v18 = vsel %vm88_vm2, %v1535_v12, 0  ;;  %1570 = vmatpush.bf16.msrb.mxu1 %v1561_v62 }
 0xd61   :  { %1549 = vmatpush.bf16.msra.mxu0 %v1540_v18 }
 0xd63   :  { %2188 = vmatmul.msk.bf16.vlgmr.msrb.gmra.mxu1 %vm319_vm1, %v1427_v60 }
 0xd67   :  { %v1398_v63 = vpop.xlane.xlu2 %1397 }
 0xd68   :  { %2432 = vrcp.f32 %v1398_v63 }
 0xd6e   :  { %v2433_v38 = vpop.eup %2432 }
 0xd6f   :  { %v1418_v19 = vmul.f32 %v2433_v38, %v2421_v27  ;;  %v1392_v31 = vpop.xlane.xlu2 %1391 }
 0xd70   :  { %2434 = vrcp.f32 %v1392_v31 }
 0xd71   :  { %v1426_v0 = vpack.c.bf16 %v1418_v19, %v1418_v19  ;;  %2436 = vrcp.f32 %v1404_v54 }
 0xd73   :  { %2187 = vmatmul.msk.bf16.vlgmr.msra.gmra.mxu0 %vm319_vm1, %v1426_v0 }
 0xd76   :  { %v2435_v2 = vpop.eup %2434 }
 0xd77   :  { %v1416_v58 = vmul.f32 %v2435_v2, %v2423_v41  ;;  %v1577_v3 = vpop.permute.xlu2 %1576  ;;  %v2437_v29 = vpop.eup %2436 }
 0xd78   :  { %v1582_v4 = vsel %vm88_vm2, %v1577_v3, 0  ;;  %v1420_v40 = vmul.f32 %v2437_v29, %v3027_v9 }
 0xd79   :  { %v1424_v6 = vpack.c.bf16 %v1416_v58, %v1416_v58  ;;  %1591 = vmatpush.bf16.msrb.mxu2 %v1582_v4 }
 0xd7a   :  { %v1428_v11 = vpack.c.bf16 %v1420_v40, %v1420_v40 }
 0xd7b   :  { %2185 = vmatmul.msk.bf16.vlgmr.msra.gmra.mxu2 %vm319_vm1, %v1424_v6  ;;  %v2279_v6 = vld [vmem:[%s3173_s13 + $0x10] sm:$0xff] }
 0xd8b   :  { %2189 = vmatmul.msk.bf16.vlgmr.msrb.gmra.mxu2 %vm319_vm1, %v1428_v11 }
 0xd98   :  { %v1467_v39 = vpop.f32.mrf.mxu0 }
 0xda0   :  { %v1469_v5 = vpop.f32.mrf.mxu0 }
 0xdaf   :  { %v1488_v10 = vpop.f32.mrf.mxu1 }
 0xdb7   :  { %v1490_v35 = vpop.f32.mrf.mxu1 }
 0xdcb   :  { %v1530_v15 = vpop.f32.mrf.mxu3 }
 0xdd3   :  { %v1532_v16 = vpop.f32.mrf.mxu3 }
 0xde0   :  { %v1572_v17 = vpop.f32.mrf.mxu1 }
 0xde8   :  { %v1574_v20 = vpop.f32.mrf.mxu1 }
 0xdf0   :  { %v1551_v8 = vpop.f32.mrf.mxu0 }
 0xdf1   :  { %v2324_v23 = vpack.i.bf16 %v1551_v8, %v1530_v15 }
 0xdf3   :  { %2325 = vrot.lane.b32.xlu2 %v2324_v23, %s3214_s24 }
 0xdf8   :  { %v1553_v32 = vpop.f32.mrf.mxu0 }
 0xdfe   :  { %v1509_v47 = vpop.f32.mrf.mxu2 }
 0xdff   :  { %v2319_v21 = vpack.i.bf16 %v1509_v47, %v1488_v10 }
 0xe01   :  { %2320 = vrot.lane.b32.xlu0 %v2319_v21, %s3215_s25  ;;  %v2348_v21 = vld [vmem:[%s3171_s11 + $0x1] ss:$0 sm:$0xff]  ;;  %s2076_s25 = sshll.u32 %s3183_s23, 4  ;;  %s2077_s25 = int_to_ptr.hbm [resolvable:$true] %s2076_s25 }
 0xe06   :  { %v1511_v9 = vpop.f32.mrf.mxu2 }
 0xe0e   :  { %v1593_v22 = vpop.f32.mrf.mxu2 }
 0xe0f   :  { %v2329_v25 = vpack.i.bf16 %v1593_v22, %v1572_v17 }
 0xe11   :  { %2330 = vrot.lane.b32.xlu1 %v2329_v25, %s3216_s5 }
 0xe16   :  { %v1595_v30 = vpop.f32.mrf.mxu2 }
 0xe17   :  { %v2349_v30 = vld [vmem:[%s3172_s12 + $0x1] ss:$0 sm:$0xff] }
 0xe4d   :  { %v2326_v41 = vpop.permute.xlu2 %2325 }
 0xe4e   :  { %v2328_v50 = vunpack.i.h.bf16 %v2326_v41  ;;  %v2327_v44 = vunpack.i.l.bf16 %v2326_v41 }
 0xe73   :  { %v2321_v34 = vpop.permute.xlu0 %2320 }
 0xe74   :  { %v2323_v27 = vunpack.i.h.bf16 %v2321_v34  ;;  %v2322_v36 = vunpack.i.l.bf16 %v2321_v34 }
 0xe76   :  { %v1621_v43 = vsel %vm319_vm1, %v3046_v28, %v2322_v36  ;;  %v1622_v46 = vsel %vm319_vm1, %v1467_v39, %v2323_v27 }
 0xe77   :  { %v1623_v49 = vsel %vm806_vm0, %v1621_v43, %v2327_v44  ;;  %v1624_v52 = vsel %vm806_vm0, %v1622_v46, %v2328_v50  ;;  %v2284_v43 = vld [vmem:[%s3175_s15 + $0x38] sm:$0xff]  ;;  %v2283_v46 = vld [vmem:[%s3175_s15 + $0x30] sm:$0xff]  ;;  %v2282_v50 = vld [vmem:[%s3175_s15 + $0x28] sm:$0xff] }
 0xe78   :  { %1831 = vmatpush.bf16.msra.mxu1 %v2284_v43  ;;  %v2281_v44 = vld [vmem:[%s3175_s15 + $0x20] sm:$0xff] }
 0xe7c   :  { %1832 = vmatpush.bf16.msra.mxu1 %v2283_v46 }
 0xe80   :  { %1833 = vmatpush.bf16.msra.mxu1 %v2282_v50 }
 0xe83   :  { %v2331_v45 = vpop.permute.xlu1 %2330 }
 0xe84   :  { %v2333_v48 = vunpack.i.h.bf16 %v2331_v45  ;;  %v2332_v51 = vunpack.i.l.bf16 %v2331_v45  ;;  %v2350_v45 = vld [vmem:[%s3174_s14 + $0x1] ss:$0 sm:$0xff]  ;;  %1834 = vmatpush.bf16.msra.mxu1 %v2281_v44 }
 0xe86   :  { %v1626_v42 = vsel %vm809_vm4, %v1624_v52, %v2333_v48  ;;  %v1625_v53 = vsel %vm809_vm4, %v1623_v49, %v2332_v51 }
 0xe87   :  { %v1627_v55 = vpack.c.bf16 %v1626_v42, %v1625_v53 }
 0xe89   :  { %2203 = vmatmul.msk.bf16.vlgmr.msrb.gmra.mxu3 %vm199_vm8, %v1627_v55 }
 0xf0c   :  { %v1662_v28 = vpop.f32.mrf.mxu3 }
 0xf0d   :  { %v1663_v26 = vadd.f32 %v2347_v56, %v1662_v28 }
 0xf0f   :  { %v1667_v57 = vadd.f32 %v1663_v26, %v2925_v13 }
 0xf11   :  { %v1673_v54 = vsel %vm199_vm8, %v1667_v57, 0.0 }
 0xf12   :  { %1674 = vadd.xlane.f32.xlu0 %v1673_v54 }
 0xf14   :  { %v1664_v7 = vpop.f32.mrf.mxu3 }
 0xf15   :  { %v1665_v59 = vadd.f32 %v2347_v56, %v1664_v7 }
 0xf17   :  { %v1668_v61 = vadd.f32 %v1665_v59, %v2927_v1  ;;  %v2280_v1 = vld [vmem:[%s3173_s13 + $0x18] sm:$0xff] }
 0xf18   :  { %1759 = vmatpush.bf16.msrb.mxu0 %v2280_v1 }
 0xf19   :  { %v1676_v62 = vsel %vm199_vm8, %v1668_v61, 0.0 }
 0xf1a   :  { %1677 = vadd.xlane.f32.xlu2 %v1676_v62 }
 0xf1c   :  { %1760 = vmatpush.bf16.msrb.mxu0 %v2279_v6 }
 0xf85   :  { %v1675_v12 = vpop.xlane.xlu0 %1674 }
 0xf86   :  { %v1679_v18 = vmul.f32 %v1675_v12, %v2646_v37 }
 0xf88   :  { %v1681_v60 = vsub.f32 %v1667_v57, %v1679_v18 }
 0xf8a   :  { %v1683_v63 = vmul.f32 %v1681_v60, %v1681_v60 }
 0xf8c   :  { %v1685_v38 = vsel %vm199_vm8, %v1683_v63, 0.0 }
 0xf8d   :  { %v1678_v19 = vpop.xlane.xlu2 %1677  ;;  %1686 = vadd.xlane.f32.xlu1 %v1685_v38 }
 0xf8e   :  { %v1680_v13 = vmul.f32 %v1678_v19, %v2646_v37 }
 0xf90   :  { %v1682_v31 = vsub.f32 %v1668_v61, %v1680_v13 }
 0xf92   :  { %v1684_v0 = vmul.f32 %v1682_v31, %v1682_v31 }
 0xf94   :  { %v1688_v2 = vsel %vm199_vm8, %v1684_v0, 0.0 }
 0xf95   :  { %1689 = vadd.xlane.f32.xlu0 %v1688_v2  ;;  %v2351_v2 = vld [vmem:[%s3176_s16 + $0x1] ss:$0 sm:$0xff] }
0x1000   :  { %v1687_v58 = vpop.xlane.xlu1 %1686 }
0x1001   :  { %v1691_v3 = vmul.f32 %v1687_v58, %v2646_v37 }
0x1003   :  { %v1693_v4 = vadd.f32 1e-12, %v1691_v3 }
0x1005   :  { %2438 = vrsqrt.f32 %v1693_v4  ;;  %vm1701_vm2 = vweird.f32 %v1693_v4 }
0x1008   :  { %v1690_v29 = vpop.xlane.xlu0 %1689 }
0x1009   :  { %v1692_v40 = vmul.f32 %v1690_v29, %v2646_v37 }
0x100b   :  { %v2439_v11 = vpop.eup %2438  ;;  %v1694_v39 = vadd.f32 1e-12, %v1692_v40 }
0x100c   :  { %v1696_v5 = vmul.f32 %v2439_v11, %v1693_v4  ;;  %vm1702_vm1 = vweird.f32 %v2439_v11 }
0x100d   :  { %2440 = vrsqrt.f32 %v1694_v39  ;;  %vm1703_vm4 = vmor %vm1701_vm2, %vm1702_vm1  ;;  %vm1711_vm9 = vweird.f32 %v1694_v39 }
0x100e   :  { %v1697_v10 = vmul.f32 %v2439_v11, %v1696_v5 }
0x1010   :  { %v1698_v35 = vmul.f32 0.5, %v1697_v10 }
0x1012   :  { %v1699_v15 = vsub.f32 1.5, %v1698_v35 }
0x1013   :  { %v2441_v16 = vpop.eup %2440 }
0x1014   :  { %v1700_v17 = vmul.f32 %v2439_v11, %v1699_v15  ;;  %v1706_v20 = vmul.f32 %v2441_v16, %v1694_v39  ;;  %vm1712_vm7 = vweird.f32 %v2441_v16  ;;  %v1903_v39 = vshrl.u32 %v122_v14, 7 }
0x1015   :  { %vm1713_vm10 = vmor %vm1711_vm9, %vm1712_vm7  ;;  %vm1973_vm7 = vcmask 1041409  }
0x1016   :  { %v1707_v8 = vmul.f32 %v2441_v16, %v1706_v20  ;;  %v1704_v23 = vsel %vm1703_vm4, %v2439_v11, %v1700_v17  ;;  %2334 = vset.pattern.permute.xlu0 %v1903_v39  ;;  %2335 = vset.pattern.permute.xlu2 %v1903_v39 }
0x1017   :  { %v1715_v9 = vmul.f32 %v1704_v23, %v1681_v60 }
0x1018   :  { %v1708_v32 = vmul.f32 0.5, %v1707_v8 }
0x1019   :  { %v1720_v33 = vmul.f32 %v2348_v21, %v1715_v9 }
0x101a   :  { %v1709_v47 = vsub.f32 1.5, %v1708_v32 }
0x101b   :  { %v1725_v27 = vadd.f32 %v2349_v30, %v1720_v33 }
0x101c   :  { %v1710_v22 = vmul.f32 %v2441_v16, %v1709_v47 }
0x101e   :  { %v1714_v25 = vsel %vm1713_vm10, %v2441_v16, %v1710_v22 }
0x101f   :  { %v1716_v24 = vmul.f32 %v1714_v25, %v1682_v31  ;;  %v2456_v31 = vld [vmem:[%s3211_s7] sm:$0x3] }
0x1020   :  { %v1932_v0 = vsel %vm1931_vm11, %v2456_v31, 0.0  ;;  %v1901_v5 = vperm.slane %v2456_v31, 0 }
0x1021   :  { %v1721_v34 = vmul.f32 %v2348_v21, %v1716_v24  ;;  %1933 = vadd.xlane.f32.xlu0 %v1932_v0  ;;  %v1908_v24 = vperm.slane %v2456_v31, 1 }
0x1023   :  { %v1726_v36 = vadd.f32 %v2349_v30, %v1721_v34 }
0x1025   :  { %v1727_v41 = vpack.c.bf16 %v1726_v36, %v1725_v27 }
0x1027   :  { %2219 = vmatmul.msk.bf16.vlgmr.msrb.gmra.mxu0 %vm199_vm8, %v1727_v41 }
0x1035   :  { %1906 = vperm.xlu0 %2334, %v1901_v5  }
0x1094   :  { %v1934_v35 = vpop.xlane.xlu0 %1933 }
0x1095   :  { %v1935_v16 = vrot.slane %v1934_v35, 4 }
0x1097   :  { %v1936_v20 = vadd.f32 %v1935_v16, %v1934_v35 }
0x1099   :  { %v1937_v23 = vrot.slane %v1936_v20, 2 }
0x109b   :  { %v1938_v47 = vadd.f32 %v1937_v23, %v1936_v20 }
0x109d   :  { %v1939_v9 = vrot.slane %v1938_v47, 1 }
0x109f   :  { %v1940_v25 = vadd.f32 %v1939_v9, %v1938_v47 }
0x10a1   :  { %2288 = vpush %v1940_v25 }
0x10a4   :  { %v1762_v48 = vpop.f32.mrf.mxu0 }
0x10a5   :  { %v1763_v51 = vadd.f32 %v2350_v45, %v1762_v48 }
0x10a7   :  { %v1769_v49 = vmul.f32 0.044715, %v1763_v51  ;;  %v1767_v18 = vmul.f32 0.5, %v1763_v51 }
0x10a9   :  { %v1771_v52 = vmul.f32 %v1769_v49, %v1763_v51 }
0x10ab   :  { %v1773_v42 = vmul.f32 %v1771_v52, %v1763_v51 }
0x10ac   :  { %v1764_v53 = vpop.f32.mrf.mxu0 }
0x10ad   :  { %v1775_v55 = vadd.f32 %v1773_v42, %v1763_v51  ;;  %v1765_v56 = vadd.f32 %v2350_v45, %v1764_v53 }
0x10af   :  { %v1770_v28 = vmul.f32 0.044715, %v1765_v56  ;;  %v1777_v26 = vmul.f32 0.7978846, %v1775_v55  ;;  %v1768_v60 = vmul.f32 0.5, %v1765_v56  ;;  %v2286_v55 = vld [vmem:[%s3179_s19 + $0x8] sm:$0xff] }
0x10b0   :  { %1997 = vmatpush.bf16.msra.mxu2 %v2286_v55 }
0x10b1   :  { %v1772_v57 = vmul.f32 %v1770_v28, %v1765_v56  ;;  %2442 = vtanh.f32 %v1777_v26  ;;  %v2353_v26 = vld [vmem:[%s3212_s0 + $0x1] ss:$0 sm:$0xff] }
0x10b3   :  { %v1774_v54 = vmul.f32 %v1772_v57, %v1765_v56 }
0x10b5   :  { %v1776_v7 = vadd.f32 %v1774_v54, %v1765_v56 }
0x10b7   :  { %v1778_v59 = vmul.f32 0.7978846, %v1776_v7  ;;  %v2443_v61 = vpop.eup %2442  ;;  %v2285_v7 = vld [vmem:[%s3179_s19] sm:$0xff] }
0x10b8   :  { %v1781_v62 = vadd.f32 1.0, %v2443_v61  ;;  %1998 = vmatpush.bf16.msra.mxu2 %v2285_v7 }
0x10b9   :  { %2444 = vtanh.f32 %v1778_v59 }
0x10ba   :  { %v1783_v38 = vmul.f32 %v1781_v62, %v1767_v18 }
0x10bf   :  { %v2445_v12 = vpop.eup %2444 }
0x10c0   :  { %v1782_v63 = vadd.f32 1.0, %v2445_v12  ;;  %v1907_v12 = vpop.permute.xlu0 %1906 }
0x10c2   :  { %v1784_v19 = vmul.f32 %v1782_v63, %v1768_v60 }
0x10c4   :  { %v1785_v13 = vpack.c.bf16 %v1784_v19, %v1783_v38 }
0x10c6   :  { %2245 = vmatmul.msk.bf16.vlgmr.msra.gmra.mxu1 %vm1001_vm12, %v1785_v13 }
0x10d2   :  { %s2289_s16 = spop %2288 }
0x10d3   :  { %v1942_v51 = vstv %s2289_s16 }
0x10d4   :  { %vm1948_vm6 = vweird.f32 %v1942_v51  ;;  %v1954_v39 = vand.u32 2147483648, %v1942_v51  ;;  %v1952_v35 = vand.u32 2147483647, %v1942_v51 }
0x10d6   :  { %v1955_v20 = vor.u32 1.1754944e-38, %v1954_v39  ;;  %vm1953_vm4 = vcmp.eq.f32.partialorder %v1952_v35, 8.507059e+37 }
0x1143   :  { %v1836_v1 = vpop.f32.mrf.mxu1 }
0x1144   :  { %v1837_v58 = vadd.f32 %v2351_v2, %v1836_v1 }
0x1146   :  { %v1841_v3 = vadd.f32 %v1837_v58, %v1725_v27 }
0x1148   :  { %v1847_v4 = vsel %vm199_vm8, %v1841_v3, 0.0 }
0x1149   :  { %1848 = vadd.xlane.f32.xlu2 %v1847_v4 }
0x114b   :  { %v1838_v6 = vpop.f32.mrf.mxu1 }
0x114c   :  { %v1839_v29 = vadd.f32 %v2351_v2, %v1838_v6 }
0x114e   :  { %v1842_v40 = vadd.f32 %v1839_v29, %v1726_v36 }
0x1150   :  { %v1850_v11 = vsel %vm199_vm8, %v1842_v40, 0.0 }
0x1151   :  { %1851 = vadd.xlane.f32.xlu1 %v1850_v11 }
0x11bc   :  { %v1849_v10 = vpop.xlane.xlu2 %1848 }
0x11bd   :  { %v1853_v15 = vmul.f32 %v1849_v10, %v2646_v37 }
0x11bf   :  { %v1855_v17 = vsub.f32 %v1841_v3, %v1853_v15 }
0x11c1   :  { %v1857_v8 = vmul.f32 %v1855_v17, %v1855_v17 }
0x11c3   :  { %v1859_v32 = vsel %vm199_vm8, %v1857_v8, 0.0 }
0x11c4   :  { %v1852_v21 = vpop.xlane.xlu1 %1851  ;;  %1860 = vadd.xlane.f32.xlu2 %v1859_v32 }
0x11c5   :  { %v1854_v14 = vmul.f32 %v1852_v21, %v2646_v37 }
0x11c7   :  { %v1856_v22 = vsub.f32 %v1842_v40, %v1854_v14 }
0x11c9   :  { %v1858_v30 = vmul.f32 %v1856_v22, %v1856_v22 }
0x11cb   :  { %v1862_v33 = vsel %vm199_vm8, %v1858_v30, 0.0 }
0x11cc   :  { %1863 = vadd.xlane.f32.xlu1 %v1862_v33 }
0x11dc   :  { %1913 = vperm.xlu2 %2335, %v1908_v24  }
0x1237   :  { %v1861_v34 = vpop.xlane.xlu2 %1860 }
0x1238   :  { %v1865_v27 = vmul.f32 %v1861_v34, %v2646_v37 }
0x123a   :  { %v1867_v36 = vadd.f32 1e-12, %v1865_v27 }
0x123c   :  { %2446 = vrsqrt.f32 %v1867_v36  ;;  %vm1875_vm13 = vweird.f32 %v1867_v36 }
0x123f   :  { %v1864_v41 = vpop.xlane.xlu1 %1863  ;;  %v1914_v3 = vpop.permute.xlu2 %1913 }
0x1240   :  { %v1866_v43 = vmul.f32 %v1864_v41, %v2646_v37  ;;  %v2352_v37 = vld [vmem:[%s3177_s17 + $0x1] ss:$0 sm:$0xff] }
0x1241   :  { %v2287_v41 = vld [vmem:[%s3181_s21] sm:$0xff] }
0x1242   :  { %v2447_v46 = vpop.eup %2446  ;;  %v1868_v50 = vadd.f32 1e-12, %v1866_v43  ;;  %2028 = vmatpush.bf16.msra.mxu3 %v2287_v41  ;;  %v2354_v43 = vld [vmem:[%s3180_s20] ss:$0 sm:$0xff]  ;;  %s2494_s20 = smov [#allocation2]  }
0x1243   :  { %v1870_v44 = vmul.f32 %v2447_v46, %v1867_v36  ;;  %vm1876_vm12 = vweird.f32 %v2447_v46  ;;  %s2074_s21 = sshll.u32 %s2494_s20, 4  ;;  %s2075_s21 = int_to_ptr.vmem [resolvable:$true] %s2074_s21 }
0x1244   :  { %2448 = vrsqrt.f32 %v1868_v50  ;;  %vm1877_vm14 = vmor %vm1875_vm13, %vm1876_vm12  ;;  %vm1885_vm3 = vweird.f32 %v1868_v50 }
0x1245   :  { %v1871_v45 = vmul.f32 %v2447_v46, %v1870_v44  ;;  %2450 = vrcp.f32 %v1942_v51 }
0x1247   :  { %v1872_v48 = vmul.f32 0.5, %v1871_v45 }
0x1249   :  { %v1873_v49 = vsub.f32 1.5, %v1872_v48 }
0x124a   :  { %v2449_v52 = vpop.eup %2448 }
0x124b   :  { %v1874_v42 = vmul.f32 %v2447_v46, %v1873_v49  ;;  %v1880_v53 = vmul.f32 %v2449_v52, %v1868_v50  ;;  %v2451_v59 = vpop.eup %2450  ;;  %vm1886_vm15 = vweird.f32 %v2449_v52 }
0x124c   :  { %v1944_v63 = vmul.f32 %v2451_v59, %v1942_v51  ;;  %vm1887_vm5 = vmor %vm1885_vm3, %vm1886_vm15  ;;  %vm1949_vm1 = vweird.f32 %v2451_v59  ;;  %v2355_v51 = vld [vmem:[%s3182_s22] ss:$0 sm:$0xff] }
0x124d   :  { %v1881_v56 = vmul.f32 %v2449_v52, %v1880_v53  ;;  %v1878_v28 = vsel %vm1877_vm14, %v2447_v46, %v1874_v42  ;;  %vm1950_vm2 = vmor %vm1948_vm6, %vm1949_vm1 }
0x124e   :  { %v1889_v57 = vmul.f32 %v1878_v28, %v1855_v17  ;;  %v1945_v0 = vsub.f32 1.0, %v1944_v63 }
0x124f   :  { %v1882_v54 = vmul.f32 0.5, %v1881_v56 }
0x1250   :  { %v1894_v61 = vmul.f32 %v2352_v37, %v1889_v57  ;;  %v1946_v6 = vmul.f32 %v2451_v59, %v1945_v0 }
0x1251   :  { %v1883_v62 = vsub.f32 1.5, %v1882_v54 }
0x1252   :  { %v1899_v18 = vadd.f32 %v2353_v26, %v1894_v61  ;;  %v1947_v10 = vadd.f32 %v2451_v59, %v1946_v6 }
0x1253   :  { %v1884_v60 = vmul.f32 %v2449_v52, %v1883_v62 }
0x1254   :  { %v1915_v38 = vmul.f32 %v1907_v12, %v1899_v18  ;;  %v1951_v8 = vsel %vm1950_vm2, %v2451_v59, %v1947_v10 }
0x1255   :  { %v1888_v19 = vsel %vm1887_vm5, %v2449_v52, %v1884_v60  ;;  %v1956_v21 = vsel %vm1953_vm4, %v1955_v20, %v1951_v8 }
0x1256   :  { %v1917_v13 = vsel %vm199_vm8, %v1915_v38, 0.0  ;;  %v1890_v31 = vmul.f32 %v1888_v19, %v1856_v22 }
0x1257   :  { %v1918_v2 = vrot.slane %v1917_v13, 4 }
0x1258   :  { %v1895_v1 = vmul.f32 %v2352_v37, %v1890_v31 }
0x1259   :  { %v1919_v58 = vadd.f32 %v1918_v2, %v1917_v13 }
0x125a   :  { %v1900_v4 = vadd.f32 %v2353_v26, %v1895_v1 }
0x125b   :  { %v1920_v29 = vrot.slane %v1919_v58, 2 }
0x125c   :  { %v1916_v40 = vmul.f32 %v1914_v3, %v1900_v4 }
0x125d   :  { %v1921_v11 = vadd.f32 %v1920_v29, %v1919_v58 }
0x125e   :  { %v1924_v5 = vsel %vm199_vm8, %v1916_v40, 0.0 }
0x125f   :  { %v1922_v15 = vrot.slane %v1921_v11, 1  ;;  %v1925_v16 = vrot.slane %v1924_v5, 4 }
0x1261   :  { %v1926_v17 = vadd.f32 %v1925_v16, %v1924_v5  ;;  %v1923_v23 = vadd.f32 %v1922_v15, %v1921_v11 }
0x1263   :  { %v1927_v32 = vrot.slane %v1926_v17, 2  ;;  %v1957_v14 = vmul.f32 %v1956_v21, %v1923_v23 }
0x1265   :  { %v1928_v47 = vadd.f32 %v1927_v32, %v1926_v17  ;;  %v1959_v25 = vpack.c.bf16 %v1957_v14, %v1957_v14 }
0x1267   :  { %v1929_v9 = vrot.slane %v1928_v47, 1  ;;  %v1971_v24 = vunpack.c.l.b16 %v1959_v25 }
0x1269   :  { %v1930_v22 = vadd.f32 %v1929_v9, %v1928_v47 }
0x126b   :  { %v1958_v30 = vmul.f32 %v1956_v21, %v1930_v22 }
0x126d   :  { %v1960_v33 = vpack.c.bf16 %v1958_v30, %v1958_v30 }
0x126f   :  { %v1972_v34 = vunpack.c.l.b16 %v1960_v33 }
0x1271   :  { %v1974_v27 = vsel %vm1973_vm7, %v1972_v34, %v1971_v24 }
0x1272   :  { %v1975_v36 = vpack.c.b16 %v1974_v27, %v1974_v27 }
0x1274   :  { %2256 = vmatmul.msk.bf16.vlgmr.msra.gmra.mxu2 %vm199_vm8, %v1975_v36  ;;  %vm2036_vm8 = vcmask 123904  }
0x12f7   :  { %v2000_v46 = vpop.f32.mrf.mxu2 }
0x12f8   :  { %v2001_v50 = vadd.f32 %v2354_v43, %v2000_v46 }
0x12fa   :  { %v2004_v44 = vmax.f32 %v2001_v50, 0.0 }
0x12fc   :  { %v2005_v45 = vpack.c.bf16 %v2004_v44, %v2004_v44 }
0x12fe   :  { %2261 = vmatmul.msk.bf16.vlgmr.msra.gmra.mxu3 %vm806_vm0, %v2005_v45 }
0x12ff   :  { %v2002_v48 = vpop.f32.mrf.mxu2 }
0x1381   :  { %v2030_v49 = vpop.f32.mrf.mxu3 }
0x1382   :  { %v2031_v52 = vadd.f32 %v2355_v51, %v2030_v49 }
0x1384   :  { %v2034_v42 = vmax.f32 %v2031_v52, 0.0 }
0x1386   :  { %v2035_v53 = vmul.f32 %v2034_v42, %v2034_v42 }
0x1388   :  { %v2037_v37 = vsel %vm2036_vm8, %v2035_v53, 0.0 }
0x1389   :  { %v2032_v55 = vpop.f32.mrf.mxu3  ;;  %2038 = vadd.xlane.f32.xlu1 %v2037_v37 }
0x13fc   :  { %v2039_v56 = vpop.xlane.xlu1 %2038 }
0x13fd   :  { %2452 = vrsqrt.f32 %v2039_v56  ;;  %vm2047_vm0 = vcmp.eq.f32.partialorder %v2039_v56, inf  ;;  %v2050_v62 = vand.u32 2147483648, %v2039_v56  ;;  %vm2049_vm9 = vcmp.eq.f32.partialorder %v2039_v56, 0.0 }
0x1403   :  { %v2453_v28 = vpop.eup %2452 }
0x1404   :  { %v2041_v26 = vmul.f32 %v2453_v28, %v2039_v56 }
0x1406   :  { %v2042_v57 = vmul.f32 %v2453_v28, %v2041_v26 }
0x1408   :  { %v2043_v54 = vmul.f32 0.5, %v2042_v57 }
0x140a   :  { %v2044_v7 = vsub.f32 1.5, %v2043_v54 }
0x140c   :  { %v2045_v59 = vmul.f32 %v2453_v28, %v2044_v7 }
0x140e   :  { %v2046_v61 = vmul.f32 %v2045_v59, %v2039_v56 }
0x1410   :  { %v2048_v12 = vsel %vm2047_vm0, %v2039_v56, %v2046_v61 }
0x1411   :  { %v2051_v18 = vsel %vm2049_vm9, %v2050_v62, %v2048_v12 }
0x1412   :  { %v2052_v60 = vmax.f32 %v2051_v18, 1e-12 }
0x1414   :  { %2454 = vrcp.f32 %v2052_v60  ;;  %v2064_v13 = vand.u32 2147483648, %v2052_v60  ;;  %v2062_v0 = vand.u32 2147483647, %v2052_v60  ;;  %vm2058_vm11 = vweird.f32 %v2052_v60 }
0x1416   :  { %v2065_v1 = vor.u32 1.1754944e-38, %v2064_v13  ;;  %vm2063_vm13 = vcmp.eq.f32.partialorder %v2062_v0, 8.507059e+37 }
0x141a   :  { %v2455_v63 = vpop.eup %2454 }
0x141b   :  { %v2054_v38 = vmul.f32 %v2455_v63, %v2052_v60  ;;  %vm2059_vm10 = vweird.f32 %v2455_v63 }
0x141c   :  { %vm2060_vm12 = vmor %vm2058_vm11, %vm2059_vm10 }
0x141d   :  { %v2055_v19 = vsub.f32 1.0, %v2054_v38 }
0x141f   :  { %v2056_v31 = vmul.f32 %v2455_v63, %v2055_v19 }
0x1421   :  { %v2057_v2 = vadd.f32 %v2455_v63, %v2056_v31 }
0x1423   :  { %v2061_v58 = vsel %vm2060_vm12, %v2455_v63, %v2057_v2 }
0x1424   :  { %v2066_v3 = vsel %vm2063_vm13, %v2065_v1, %v2061_v58 }
0x1425   :  { %v2067_v4 = vmul.f32 %v2066_v3, %v2034_v42 }
0x1427   :  { %2068 = vst.msk [vmem:[#allocation2] sm:$0x3] %vm2036_vm8, %v2067_v4 }
0x1428   :  { %2079 = dma.vmem_to_hbm [thread:$0]  %s2075_s21, 32, %s2077_s25, [#allocation3]  }
0x1429   :  { %2481 = dma.done.wait [#allocation3], 32  }
0x142a   :  { %2482 = vsyncadd [#allocation3], 4294967264 }
0x142b   :  { %2084 = vsyncpa [#allocation3], 1 }

</bundles_post_ra>
